<compile_context>
chip_gen: v7x
topology: tpu7x:2x2x1
jax: 0.10.0
libtpu: 0.0.40
codegen_flags: <defaults>
</compile_context>

<pallas_src>
import functools

import jax
import jax.numpy as jnp
from jax import lax
from jax.experimental import pallas as pl
from jax.experimental.pallas import tpu as pltpu

EPS = 1e-5  # nn.InstanceNorm2d default eps


# ---------------------------------------------------------------------------
# Wrapper-side helpers
# ---------------------------------------------------------------------------
def _tap_masks(H, W, dtype=jnp.float32):
    """(9, H*W) validity masks (0/1) for the 9 taps of a 3x3 'SAME' convolution.

    Precomputed once in the wrapper (identical for every batch element) and passed as a
    resident VMEM input instead of being rebuilt from iota every grid step.
    """
    HW = H * W
    lane = jnp.arange(HW, dtype=jnp.int32)
    hh = lane // W
    ww = lane % W
    rows = []
    for dh in (-1, 0, 1):
        for dw in (-1, 0, 1):
            valid = (hh + dh >= 0) & (hh + dh < H) & (ww + dw >= 0) & (ww + dw < W)
            rows.append(valid)
    return jnp.stack(rows, axis=0).astype(dtype)          # (9, HW)


def _vmem_budget_bytes(Cin_p, Cout_p, HW, mxu_bytes):
    """Explicit scoped-VMEM budget from the real per-step footprint (capped at v7x 64 MiB)."""
    f32 = 4
    weights = (Cout_p * 9 * Cin_p + 2 * Cout_p * 9 * Cout_p) * mxu_bytes + 4 * Cout_p * f32
    per_step = (
        2 * Cin_p * HW * f32                      # double-buffered input block
        + 2 * Cout_p * HW * f32                   # double-buffered output block
        + 2 * 9 * HW * f32                        # resident masks
        + 2 * weights                             # resident weights
        + 9 * max(Cin_p, Cout_p) * HW * mxu_bytes # persistent patch scratch
        + 4 * Cout_p * HW * f32                   # live f32 intermediates (y / taps in flight)
    )
    est = int(per_step * 1.5) + (1 << 20)         # 1.5x margin + 1 MiB headroom
    return int(min(max(est, 8 << 20), 64 << 20))  # keep within v7x's 64 MiB per-TC ceiling


# ---------------------------------------------------------------------------
# In-kernel helpers
# ---------------------------------------------------------------------------
def _im2col_conv(a, w_ref, mask_ref, patch_ref, H, W, mxu_dtype):
    """3x3 / stride-1 / pad-1 conv as one im2col matmul.

    a        : (C, H*W) f32 activations (spatial flattened on lanes).
    w_ref    : (Cout, 9*C) flattened weights in mxu_dtype; rows ordered (kh, kw, cin).
    mask_ref : (9, H*W) f32 0/1 boundary masks (precomputed in the wrapper).
    patch_ref: persistent VMEM scratch (9*Cmax, H*W) in mxu_dtype; taps written in place,
               matmul reads it directly (no concatenate, no zero-fill copies).
    Returns (Cout, H*W) f32.
    """
    C, L = a.shape
    rows = 9 * C
    t = 0
    for dh in (-1, 0, 1):
        for dw in (-1, 0, 1):
            d = dh * W + dw                                 # flat-index offset of this tap
            if d == 0:
                tap = a                                     # center tap: no shift, no mask
            else:
                # Circular roll on the XLU slot; the boundary mask zeroes exactly the
                # lanes that wrapped, so the result equals the zero-padded shift.
                tap = pltpu.roll(a, shift=(-d) % L, axis=1)
                tap = tap * mask_ref[t:t + 1, :]            # f32 select-by-multiply
            patch_ref[t * C:(t + 1) * C, :] = tap.astype(mxu_dtype)
            t += 1
    patches = patch_ref[0:rows, :]                          # (9*C, L), mxu_dtype
    return jnp.dot(w_ref[...], patches, preferred_element_type=jnp.float32)


def _instance_norm(y, gamma, beta, HW):
    """Per-(sample, channel) normalization over the lane (spatial) axis, two-pass stats."""
    inv = 1.0 / HW
    mean = jnp.sum(y, axis=1, keepdims=True) * inv          # (C, 1)
    d = y - mean
    var = jnp.sum(d * d, axis=1, keepdims=True) * inv       # biased variance, two-pass
    return d * (gamma * lax.rsqrt(var + EPS)) + beta


# ---------------------------------------------------------------------------
# Kernel
# ---------------------------------------------------------------------------
def residual_block_kernel(mask_ref, x_ref, wpre_ref, w1_ref, g1_ref, b1_ref,
                          w2_ref, g2_ref, b2_ref, out_ref, patch_ref,
                          *, H, W, mxu_dtype):
    HW = H * W
    x = x_ref[0].astype(jnp.float32)                        # (Cin_p, H*W)

    # pre: conv3x3 (bias=False)
    y_pre = _im2col_conv(x, wpre_ref, mask_ref, patch_ref, H, W, mxu_dtype)

    # Park the residual branch in the output block right away; its live range ends as soon
    # as conv1's patches are written (lower VMEM/vreg pressure through the hot region).
    out_ref[0] = y_pre.astype(out_ref.dtype)

    # main[0..2]: conv3x3 -> InstanceNorm(affine) -> ReLU
    y = _im2col_conv(y_pre, w1_ref, mask_ref, patch_ref, H, W, mxu_dtype)
    y = _instance_norm(y, g1_ref[...], b1_ref[...], HW)
    y = jnp.maximum(y, 0.0)

    # main[3..4]: conv3x3 -> InstanceNorm(affine)
    y = _im2col_conv(y, w2_ref, mask_ref, patch_ref, H, W, mxu_dtype)
    y = _instance_norm(y, g2_ref[...], b2_ref[...], HW)

    # residual add — lane-dense (Cout_p, H*W) store
    out_ref[0] = (out_ref[0].astype(jnp.float32) + y).astype(out_ref.dtype)


# ---------------------------------------------------------------------------
# Wrapper
# ---------------------------------------------------------------------------
def residual_block(x_nchw, w_pre, w1, g1, b1, w2, g2, b2, *, mxu_dtype=jnp.bfloat16):
    """x: (N, Cin, H, W) NCHW; conv weights HWIO; gamma/beta: (Cout,).

    mxu_dtype: dtype of the matmul operands (weights + patch scratch). bf16 reaches
    v6e/v7x MXU peak and halves the patch-scratch footprint; accumulation is f32 and all
    elementwise / InstanceNorm math stays f32 (v5e has no bf16 VPU/EUP path).
    """
    N, Cin, H, W = x_nchw.shape
    Cout = w_pre.shape[-1]
    HW = H * W
    # NOTE: H*W that is a multiple of 128 keeps stores lane-dense (perf only, not correctness).

    # Pad BOTH channel dims to multiples of 8 so every tap slab / weight tile is sublane-aligned.
    Cin_p = Cin + (-Cin) % 8
    Cout_p = Cout + (-Cout) % 8
    if Cin_p != Cin:
        x_nchw = jnp.pad(x_nchw, ((0, 0), (0, Cin_p - Cin), (0, 0), (0, 0)))
        w_pre = jnp.pad(w_pre, ((0, 0), (0, 0), (0, Cin_p - Cin), (0, 0)))
    if Cout_p != Cout:
        pc = Cout_p - Cout
        w_pre = jnp.pad(w_pre, ((0, 0), (0, 0), (0, 0), (0, pc)))
        w1 = jnp.pad(w1, ((0, 0), (0, 0), (0, pc), (0, pc)))
        w2 = jnp.pad(w2, ((0, 0), (0, 0), (0, pc), (0, pc)))
        g1 = jnp.pad(g1, (0, pc))
        b1 = jnp.pad(b1, (0, pc))
        g2 = jnp.pad(g2, (0, pc))
        b2 = jnp.pad(b2, (0, pc))

    x2 = x_nchw.reshape(N, Cin_p, HW)

    def flat_w(w):                            # HWIO -> (Cout, 9*Cin), rows ordered (kh, kw, cin)
        ci, co = w.shape[2], w.shape[3]
        return jnp.transpose(w, (3, 0, 1, 2)).reshape(co, 9 * ci).astype(mxu_dtype)

    wp, wf1, wf2 = flat_w(w_pre), flat_w(w1), flat_w(w2)
    g1c = g1.reshape(Cout_p, 1).astype(jnp.float32)
    b1c = b1.reshape(Cout_p, 1).astype(jnp.float32)
    g2c = g2.reshape(Cout_p, 1).astype(jnp.float32)
    b2c = b2.reshape(Cout_p, 1).astype(jnp.float32)
    masks = _tap_masks(H, W)                  # (9, HW) f32, resident

    Cmax = max(Cin_p, Cout_p)
    mxu_bytes = jnp.dtype(mxu_dtype).itemsize
    vmem_bytes = _vmem_budget_bytes(Cin_p, Cout_p, HW, mxu_bytes)

    def full(shape):
        nd = len(shape)
        return pl.BlockSpec(shape, lambda n: (0,) * nd)

    kernel = functools.partial(residual_block_kernel, H=H, W=W, mxu_dtype=mxu_dtype)
    out = pl.pallas_call(
        kernel,
        out_shape=jax.ShapeDtypeStruct((N, Cout_p, HW), x_nchw.dtype),
        grid_spec=pltpu.PrefetchScalarGridSpec(
            num_scalar_prefetch=0,
            grid=(N,),                                   # batch axis; 'parallel' for megacore
            in_specs=[
                full((9, HW)),                           # tap masks (resident)
                pl.BlockSpec((1, Cin_p, HW), lambda n: (n, 0, 0)),
                full((Cout_p, 9 * Cin_p)),               # w_pre (flattened, mxu_dtype)
                full((Cout_p, 9 * Cout_p)),              # w1
                full((Cout_p, 1)),                       # gamma1
                full((Cout_p, 1)),                       # beta1
                full((Cout_p, 9 * Cout_p)),              # w2
                full((Cout_p, 1)),                       # gamma2
                full((Cout_p, 1)),                       # beta2
            ],
            out_specs=pl.BlockSpec((1, Cout_p, HW), lambda n: (n, 0, 0)),
            scratch_shapes=[pltpu.VMEM((9 * Cmax, HW), mxu_dtype)],   # persistent patch slab
        ),
        compiler_params=pltpu.CompilerParams(
            dimension_semantics=("parallel",),
            vmem_limit_bytes=vmem_bytes),
    )(masks, x2, wp, wf1, g1c, b1c, wf2, g2c, b2c)

    out = out.reshape(N, Cout_p, H, W)
    return out[:, :Cout] if Cout_p != Cout else out


# ---------------------------------------------------------------------------
# Pure-JAX reference (same forward pass: NCHW activations, HWIO weights)
# ---------------------------------------------------------------------------
def ref_forward(x_nchw, w_pre, w1, g1, b1, w2, g2, b2):
    dn = ("NCHW", "HWIO", "NCHW")

    def conv(x, w):
        return lax.conv_general_dilated(x, w, (1, 1), "SAME",
                                        dimension_numbers=dn,
                                        precision=lax.Precision.HIGHEST)

    def inorm(y, g, b):
        mean = jnp.mean(y, axis=(2, 3), keepdims=True)
        var = jnp.mean((y - mean) ** 2, axis=(2, 3), keepdims=True)
        return ((y - mean) * lax.rsqrt(var + EPS) * g.reshape(1, -1, 1, 1)
                + b.reshape(1, -1, 1, 1))

    yp = conv(x_nchw, w_pre)
    y = jnp.maximum(inorm(conv(yp, w1), g1, b1), 0.0)
    y = inorm(conv(y, w2), g2, b2)
    return yp + y


if __name__ == "__main__":
    N, Cin, Cout, H, W = 2, 4, 8, 16, 16

    key = jax.random.PRNGKey(0)
    ks = jax.random.split(key, 8)
    # Deterministic synthetic parameters (shapes implied by the module __init__).
    x = jax.random.normal(ks[0], (N, Cin, H, W), jnp.float32)                # NCHW, like PyTorch
    w_pre = 0.1 * jax.random.normal(ks[1], (3, 3, Cin, Cout), jnp.float32)   # HWIO
    w1 = 0.1 * jax.random.normal(ks[2], (3, 3, Cout, Cout), jnp.float32)
    w2 = 0.1 * jax.random.normal(ks[3], (3, 3, Cout, Cout), jnp.float32)
    g1 = 1.0 + 0.1 * jax.random.normal(ks[4], (Cout,), jnp.float32)
    b1 = 0.1 * jax.random.normal(ks[5], (Cout,), jnp.float32)
    g2 = 1.0 + 0.1 * jax.random.normal(ks[6], (Cout,), jnp.float32)
    b2 = 0.1 * jax.random.normal(ks[7], (Cout,), jnp.float32)

    ref = ref_forward(x, w_pre, w1, g1, b1, w2, g2, b2)

    # 1) f32 MXU operands: exact-semantics check against the reference.
    out_f32 = residual_block(x, w_pre, w1, g1, b1, w2, g2, b2, mxu_dtype=jnp.float32)
    out_f32 = jax.block_until_ready(out_f32)
    assert out_f32.shape == (N, Cout, H, W), out_f32.shape
    max_err_f32 = float(jnp.max(jnp.abs(out_f32 - ref)))
    assert jnp.allclose(out_f32, ref, atol=2e-4, rtol=2e-4), max_err_f32

    # 2) bf16 MXU operands (default; v6e/v7x peak throughput): loose sanity bound — the
    #    matmul inputs are rounded to bf16 so a tight f32 tolerance does not apply.
    out_bf16 = residual_block(x, w_pre, w1, g1, b1, w2, g2, b2)               # bf16 default
    out_bf16 = jax.block_until_ready(out_bf16)
    assert out_bf16.shape == (N, Cout, H, W), out_bf16.shape
    max_err_bf16 = float(jnp.max(jnp.abs(out_bf16 - ref)))
    assert jnp.allclose(out_bf16, ref, atol=1.5e-1, rtol=1.5e-1), max_err_bf16

    print("KERNEL_OK")
</pallas_src>

<mosaic_0001>
module attributes {stable_mosaic.version = 11 : i64} {
  func.func @residual_block_kernel(%arg0: i32, %arg1: memref<9x256xf32, #tpu.memory_space<vmem>>, %arg2: memref<1x8x256xf32, #tpu.memory_space<vmem>>, %arg3: memref<8x72xf32, #tpu.memory_space<vmem>>, %arg4: memref<8x72xf32, #tpu.memory_space<vmem>>, %arg5: memref<8x1xf32, #tpu.memory_space<vmem>>, %arg6: memref<8x1xf32, #tpu.memory_space<vmem>>, %arg7: memref<8x72xf32, #tpu.memory_space<vmem>>, %arg8: memref<8x1xf32, #tpu.memory_space<vmem>>, %arg9: memref<8x1xf32, #tpu.memory_space<vmem>>, %arg10: memref<1x8x256xf32, #tpu.memory_space<vmem>>, %arg11: memref<72x256xf32, #tpu.memory_space<vmem>>) attributes {dimension_semantics = [#tpu.dimension_semantics<parallel>], iteration_bounds = array<i64: 2>, scalar_prefetch = 0 : i64, scratch_operands = 1 : i64, tpu.core_type = #tpu.core_type<tc>, window_params = [{pipeline_mode = #tpu.pipeline_mode<synchronous>, transform_indices = @transform_0, window_bounds = array<i64: 9, 256>}, {transform_indices = @transform_1, window_bounds = array<i64: 1, 8, 256>}, {pipeline_mode = #tpu.pipeline_mode<synchronous>, transform_indices = @transform_2, window_bounds = array<i64: 8, 72>}, {pipeline_mode = #tpu.pipeline_mode<synchronous>, transform_indices = @transform_3, window_bounds = array<i64: 8, 72>}, {pipeline_mode = #tpu.pipeline_mode<synchronous>, transform_indices = @transform_4, window_bounds = array<i64: 8, 1>}, {pipeline_mode = #tpu.pipeline_mode<synchronous>, transform_indices = @transform_5, window_bounds = array<i64: 8, 1>}, {pipeline_mode = #tpu.pipeline_mode<synchronous>, transform_indices = @transform_6, window_bounds = array<i64: 8, 72>}, {pipeline_mode = #tpu.pipeline_mode<synchronous>, transform_indices = @transform_7, window_bounds = array<i64: 8, 1>}, {pipeline_mode = #tpu.pipeline_mode<synchronous>, transform_indices = @transform_8, window_bounds = array<i64: 8, 1>}, {transform_indices = @transform_9, window_bounds = array<i64: 1, 8, 256>}]} {
    %c0 = arith.constant 0 : index
    %c0_0 = arith.constant 0 : index
    %c0_1 = arith.constant 0 : index
    %0 = vector.load %arg2[%c0, %c0_0, %c0_1] : memref<1x8x256xf32, #tpu.memory_space<vmem>>, vector<1x8x256xf32>
    %1 = vector.shape_cast %0 : vector<1x8x256xf32> to vector<8x256xf32>
    %c17_i32 = arith.constant 17 : i32
    %2 = tpu.dynamic_rotate %1 by %c17_i32 dim 1 : vector<8x256xf32>, i32 -> vector<8x256xf32>
    %c0_2 = arith.constant 0 : index
    %c0_3 = arith.constant 0 : index
    %3 = vector.load %arg1[%c0_2, %c0_3] : memref<9x256xf32, #tpu.memory_space<vmem>>, vector<1x256xf32>
    %4 = vector.broadcast %3 : vector<1x256xf32> to vector<8x256xf32>
    %5 = arith.mulf %2, %4 : vector<8x256xf32>
    %c0_4 = arith.constant 0 : index
    %c0_5 = arith.constant 0 : index
    %6 = vector.load %arg11[%c0_4, %c0_5] : memref<72x256xf32, #tpu.memory_space<vmem>>, vector<8x256xf32>
    tpu.vector_store %arg11[%c0_4, %c0_5], %5 {strides = array<i32>} : memref<72x256xf32, #tpu.memory_space<vmem>>, vector<8x256xf32>,
    %c16_i32 = arith.constant 16 : i32
    %7 = tpu.dynamic_rotate %1 by %c16_i32 dim 1 : vector<8x256xf32>, i32 -> vector<8x256xf32>
    %c1 = arith.constant 1 : index
    %c0_6 = arith.constant 0 : index
    %8 = vector.load %arg1[%c1, %c0_6] : memref<9x256xf32, #tpu.memory_space<vmem>>, vector<1x256xf32>
    %9 = vector.broadcast %8 : vector<1x256xf32> to vector<8x256xf32>
    %10 = arith.mulf %7, %9 : vector<8x256xf32>
    %c8 = arith.constant 8 : index
    %c0_7 = arith.constant 0 : index
    %11 = vector.load %arg11[%c8, %c0_7] : memref<72x256xf32, #tpu.memory_space<vmem>>, vector<8x256xf32>
    tpu.vector_store %arg11[%c8, %c0_7], %10 {strides = array<i32>} : memref<72x256xf32, #tpu.memory_space<vmem>>, vector<8x256xf32>,
    %c15_i32 = arith.constant 15 : i32
    %12 = tpu.dynamic_rotate %1 by %c15_i32 dim 1 : vector<8x256xf32>, i32 -> vector<8x256xf32>
    %c2 = arith.constant 2 : index
    %c0_8 = arith.constant 0 : index
    %13 = vector.load %arg1[%c2, %c0_8] : memref<9x256xf32, #tpu.memory_space<vmem>>, vector<1x256xf32>
    %14 = vector.broadcast %13 : vector<1x256xf32> to vector<8x256xf32>
    %15 = arith.mulf %12, %14 : vector<8x256xf32>
    %c16 = arith.constant 16 : index
    %c0_9 = arith.constant 0 : index
    %16 = vector.load %arg11[%c16, %c0_9] : memref<72x256xf32, #tpu.memory_space<vmem>>, vector<8x256xf32>
    tpu.vector_store %arg11[%c16, %c0_9], %15 {strides = array<i32>} : memref<72x256xf32, #tpu.memory_space<vmem>>, vector<8x256xf32>,
    %c1_i32 = arith.constant 1 : i32
    %17 = tpu.dynamic_rotate %1 by %c1_i32 dim 1 : vector<8x256xf32>, i32 -> vector<8x256xf32>
    %c3 = arith.constant 3 : index
    %c0_10 = arith.constant 0 : index
    %18 = vector.load %arg1[%c3, %c0_10] : memref<9x256xf32, #tpu.memory_space<vmem>>, vector<1x256xf32>
    %19 = vector.broadcast %18 : vector<1x256xf32> to vector<8x256xf32>
    %20 = arith.mulf %17, %19 : vector<8x256xf32>
    %c24 = arith.constant 24 : index
    %c0_11 = arith.constant 0 : index
    %21 = vector.load %arg11[%c24, %c0_11] : memref<72x256xf32, #tpu.memory_space<vmem>>, vector<8x256xf32>
    tpu.vector_store %arg11[%c24, %c0_11], %20 {strides = array<i32>} : memref<72x256xf32, #tpu.memory_space<vmem>>, vector<8x256xf32>,
    %c32 = arith.constant 32 : index
    %c0_12 = arith.constant 0 : index
    %22 = vector.load %arg11[%c32, %c0_12] : memref<72x256xf32, #tpu.memory_space<vmem>>, vector<8x256xf32>
    tpu.vector_store %arg11[%c32, %c0_12], %1 {strides = array<i32>} : memref<72x256xf32, #tpu.memory_space<vmem>>, vector<8x256xf32>,
    %c255_i32 = arith.constant 255 : i32
    %23 = tpu.dynamic_rotate %1 by %c255_i32 dim 1 : vector<8x256xf32>, i32 -> vector<8x256xf32>
    %c5 = arith.constant 5 : index
    %c0_13 = arith.constant 0 : index
    %24 = vector.load %arg1[%c5, %c0_13] : memref<9x256xf32, #tpu.memory_space<vmem>>, vector<1x256xf32>
    %25 = vector.broadcast %24 : vector<1x256xf32> to vector<8x256xf32>
    %26 = arith.mulf %23, %25 : vector<8x256xf32>
    %c40 = arith.constant 40 : index
    %c0_14 = arith.constant 0 : index
    %27 = vector.load %arg11[%c40, %c0_14] : memref<72x256xf32, #tpu.memory_space<vmem>>, vector<8x256xf32>
    tpu.vector_store %arg11[%c40, %c0_14], %26 {strides = array<i32>} : memref<72x256xf32, #tpu.memory_space<vmem>>, vector<8x256xf32>,
    %c241_i32 = arith.constant 241 : i32
    %28 = tpu.dynamic_rotate %1 by %c241_i32 dim 1 : vector<8x256xf32>, i32 -> vector<8x256xf32>
    %c6 = arith.constant 6 : index
    %c0_15 = arith.constant 0 : index
    %29 = vector.load %arg1[%c6, %c0_15] : memref<9x256xf32, #tpu.memory_space<vmem>>, vector<1x256xf32>
    %30 = vector.broadcast %29 : vector<1x256xf32> to vector<8x256xf32>
    %31 = arith.mulf %28, %30 : vector<8x256xf32>
    %c48 = arith.constant 48 : index
    %c0_16 = arith.constant 0 : index
    %32 = vector.load %arg11[%c48, %c0_16] : memref<72x256xf32, #tpu.memory_space<vmem>>, vector<8x256xf32>
    tpu.vector_store %arg11[%c48, %c0_16], %31 {strides = array<i32>} : memref<72x256xf32, #tpu.memory_space<vmem>>, vector<8x256xf32>,
    %c240_i32 = arith.constant 240 : i32
    %33 = tpu.dynamic_rotate %1 by %c240_i32 dim 1 : vector<8x256xf32>, i32 -> vector<8x256xf32>
    %c7 = arith.constant 7 : index
    %c0_17 = arith.constant 0 : index
    %34 = vector.load %arg1[%c7, %c0_17] : memref<9x256xf32, #tpu.memory_space<vmem>>, vector<1x256xf32>
    %35 = vector.broadcast %34 : vector<1x256xf32> to vector<8x256xf32>
    %36 = arith.mulf %33, %35 : vector<8x256xf32>
    %c56 = arith.constant 56 : index
    %c0_18 = arith.constant 0 : index
    %37 = vector.load %arg11[%c56, %c0_18] : memref<72x256xf32, #tpu.memory_space<vmem>>, vector<8x256xf32>
    tpu.vector_store %arg11[%c56, %c0_18], %36 {strides = array<i32>} : memref<72x256xf32, #tpu.memory_space<vmem>>, vector<8x256xf32>,
    %c239_i32 = arith.constant 239 : i32
    %38 = tpu.dynamic_rotate %1 by %c239_i32 dim 1 : vector<8x256xf32>, i32 -> vector<8x256xf32>
    %c8_19 = arith.constant 8 : index
    %c0_20 = arith.constant 0 : index
    %39 = vector.load %arg1[%c8_19, %c0_20] : memref<9x256xf32, #tpu.memory_space<vmem>>, vector<1x256xf32>
    %40 = vector.broadcast %39 : vector<1x256xf32> to vector<8x256xf32>
    %41 = arith.mulf %38, %40 : vector<8x256xf32>
    %c64 = arith.constant 64 : index
    %c0_21 = arith.constant 0 : index
    %42 = vector.load %arg11[%c64, %c0_21] : memref<72x256xf32, #tpu.memory_space<vmem>>, vector<8x256xf32>
    tpu.vector_store %arg11[%c64, %c0_21], %41 {strides = array<i32>} : memref<72x256xf32, #tpu.memory_space<vmem>>, vector<8x256xf32>,
    %c0_22 = arith.constant 0 : index
    %c0_23 = arith.constant 0 : index
    %43 = vector.load %arg11[%c0_22, %c0_23] : memref<72x256xf32, #tpu.memory_space<vmem>>, vector<72x256xf32>
    %c0_24 = arith.constant 0 : index
    %c0_25 = arith.constant 0 : index
    %44 = vector.load %arg3[%c0_24, %c0_25] : memref<8x72xf32, #tpu.memory_space<vmem>>, vector<8x72xf32>
    %cst = arith.constant dense<0.000000e+00> : vector<8x256xf32>
    %45 = tpu.matmul %44, %43, %cst {dimension_numbers = #tpu.dot_dimension_numbers<[1], [0], [0], [1], [0, 0, 1, 1], [], []>} : vector<8x72xf32>, vector<72x256xf32>, vector<8x256xf32> -> vector<8x256xf32>
    %c0_26 = arith.constant 0 : index
    %c0_27 = arith.constant 0 : index
    %c0_28 = arith.constant 0 : index
    %46 = vector.load %arg10[%c0_26, %c0_27, %c0_28] : memref<1x8x256xf32, #tpu.memory_space<vmem>>, vector<1x8x256xf32>
    %47 = vector.shape_cast %46 : vector<1x8x256xf32> to vector<8x256xf32>
    %48 = vector.shape_cast %45 : vector<8x256xf32> to vector<1x8x256xf32>
    tpu.vector_store %arg10[%c0_26, %c0_27, %c0_28], %48 {strides = array<i32>} : memref<1x8x256xf32, #tpu.memory_space<vmem>>, vector<1x8x256xf32>,
    %c17_i32_29 = arith.constant 17 : i32
    %49 = tpu.dynamic_rotate %45 by %c17_i32_29 dim 1 : vector<8x256xf32>, i32 -> vector<8x256xf32>
    %c0_30 = arith.constant 0 : index
    %c0_31 = arith.constant 0 : index
    %50 = vector.load %arg1[%c0_30, %c0_31] : memref<9x256xf32, #tpu.memory_space<vmem>>, vector<1x256xf32>
    %51 = vector.broadcast %50 : vector<1x256xf32> to vector<8x256xf32>
    %52 = arith.mulf %49, %51 : vector<8x256xf32>
    %c0_32 = arith.constant 0 : index
    %c0_33 = arith.constant 0 : index
    %53 = vector.load %arg11[%c0_32, %c0_33] : memref<72x256xf32, #tpu.memory_space<vmem>>, vector<8x256xf32>
    tpu.vector_store %arg11[%c0_32, %c0_33], %52 {strides = array<i32>} : memref<72x256xf32, #tpu.memory_space<vmem>>, vector<8x256xf32>,
    %c16_i32_34 = arith.constant 16 : i32
    %54 = tpu.dynamic_rotate %45 by %c16_i32_34 dim 1 : vector<8x256xf32>, i32 -> vector<8x256xf32>
    %c1_35 = arith.constant 1 : index
    %c0_36 = arith.constant 0 : index
    %55 = vector.load %arg1[%c1_35, %c0_36] : memref<9x256xf32, #tpu.memory_space<vmem>>, vector<1x256xf32>
    %56 = vector.broadcast %55 : vector<1x256xf32> to vector<8x256xf32>
    %57 = arith.mulf %54, %56 : vector<8x256xf32>
    %c8_37 = arith.constant 8 : index
    %c0_38 = arith.constant 0 : index
    %58 = vector.load %arg11[%c8_37, %c0_38] : memref<72x256xf32, #tpu.memory_space<vmem>>, vector<8x256xf32>
    tpu.vector_store %arg11[%c8_37, %c0_38], %57 {strides = array<i32>} : memref<72x256xf32, #tpu.memory_space<vmem>>, vector<8x256xf32>,
    %c15_i32_39 = arith.constant 15 : i32
    %59 = tpu.dynamic_rotate %45 by %c15_i32_39 dim 1 : vector<8x256xf32>, i32 -> vector<8x256xf32>
    %c2_40 = arith.constant 2 : index
    %c0_41 = arith.constant 0 : index
    %60 = vector.load %arg1[%c2_40, %c0_41] : memref<9x256xf32, #tpu.memory_space<vmem>>, vector<1x256xf32>
    %61 = vector.broadcast %60 : vector<1x256xf32> to vector<8x256xf32>
    %62 = arith.mulf %59, %61 : vector<8x256xf32>
    %c16_42 = arith.constant 16 : index
    %c0_43 = arith.constant 0 : index
    %63 = vector.load %arg11[%c16_42, %c0_43] : memref<72x256xf32, #tpu.memory_space<vmem>>, vector<8x256xf32>
    tpu.vector_store %arg11[%c16_42, %c0_43], %62 {strides = array<i32>} : memref<72x256xf32, #tpu.memory_space<vmem>>, vector<8x256xf32>,
    %c1_i32_44 = arith.constant 1 : i32
    %64 = tpu.dynamic_rotate %45 by %c1_i32_44 dim 1 : vector<8x256xf32>, i32 -> vector<8x256xf32>
    %c3_45 = arith.constant 3 : index
    %c0_46 = arith.constant 0 : index
    %65 = vector.load %arg1[%c3_45, %c0_46] : memref<9x256xf32, #tpu.memory_space<vmem>>, vector<1x256xf32>
    %66 = vector.broadcast %65 : vector<1x256xf32> to vector<8x256xf32>
    %67 = arith.mulf %64, %66 : vector<8x256xf32>
    %c24_47 = arith.constant 24 : index
    %c0_48 = arith.constant 0 : index
    %68 = vector.load %arg11[%c24_47, %c0_48] : memref<72x256xf32, #tpu.memory_space<vmem>>, vector<8x256xf32>
    tpu.vector_store %arg11[%c24_47, %c0_48], %67 {strides = array<i32>} : memref<72x256xf32, #tpu.memory_space<vmem>>, vector<8x256xf32>,
    %c32_49 = arith.constant 32 : index
    %c0_50 = arith.constant 0 : index
    %69 = vector.load %arg11[%c32_49, %c0_50] : memref<72x256xf32, #tpu.memory_space<vmem>>, vector<8x256xf32>
    tpu.vector_store %arg11[%c32_49, %c0_50], %45 {strides = array<i32>} : memref<72x256xf32, #tpu.memory_space<vmem>>, vector<8x256xf32>,
    %c255_i32_51 = arith.constant 255 : i32
    %70 = tpu.dynamic_rotate %45 by %c255_i32_51 dim 1 : vector<8x256xf32>, i32 -> vector<8x256xf32>
    %c5_52 = arith.constant 5 : index
    %c0_53 = arith.constant 0 : index
    %71 = vector.load %arg1[%c5_52, %c0_53] : memref<9x256xf32, #tpu.memory_space<vmem>>, vector<1x256xf32>
    %72 = vector.broadcast %71 : vector<1x256xf32> to vector<8x256xf32>
    %73 = arith.mulf %70, %72 : vector<8x256xf32>
    %c40_54 = arith.constant 40 : index
    %c0_55 = arith.constant 0 : index
    %74 = vector.load %arg11[%c40_54, %c0_55] : memref<72x256xf32, #tpu.memory_space<vmem>>, vector<8x256xf32>
    tpu.vector_store %arg11[%c40_54, %c0_55], %73 {strides = array<i32>} : memref<72x256xf32, #tpu.memory_space<vmem>>, vector<8x256xf32>,
    %c241_i32_56 = arith.constant 241 : i32
    %75 = tpu.dynamic_rotate %45 by %c241_i32_56 dim 1 : vector<8x256xf32>, i32 -> vector<8x256xf32>
    %c6_57 = arith.constant 6 : index
    %c0_58 = arith.constant 0 : index
    %76 = vector.load %arg1[%c6_57, %c0_58] : memref<9x256xf32, #tpu.memory_space<vmem>>, vector<1x256xf32>
    %77 = vector.broadcast %76 : vector<1x256xf32> to vector<8x256xf32>
    %78 = arith.mulf %75, %77 : vector<8x256xf32>
    %c48_59 = arith.constant 48 : index
    %c0_60 = arith.constant 0 : index
    %79 = vector.load %arg11[%c48_59, %c0_60] : memref<72x256xf32, #tpu.memory_space<vmem>>, vector<8x256xf32>
    tpu.vector_store %arg11[%c48_59, %c0_60], %78 {strides = array<i32>} : memref<72x256xf32, #tpu.memory_space<vmem>>, vector<8x256xf32>,
    %c240_i32_61 = arith.constant 240 : i32
    %80 = tpu.dynamic_rotate %45 by %c240_i32_61 dim 1 : vector<8x256xf32>, i32 -> vector<8x256xf32>
    %c7_62 = arith.constant 7 : index
    %c0_63 = arith.constant 0 : index
    %81 = vector.load %arg1[%c7_62, %c0_63] : memref<9x256xf32, #tpu.memory_space<vmem>>, vector<1x256xf32>
    %82 = vector.broadcast %81 : vector<1x256xf32> to vector<8x256xf32>
    %83 = arith.mulf %80, %82 : vector<8x256xf32>
    %c56_64 = arith.constant 56 : index
    %c0_65 = arith.constant 0 : index
    %84 = vector.load %arg11[%c56_64, %c0_65] : memref<72x256xf32, #tpu.memory_space<vmem>>, vector<8x256xf32>
    tpu.vector_store %arg11[%c56_64, %c0_65], %83 {strides = array<i32>} : memref<72x256xf32, #tpu.memory_space<vmem>>, vector<8x256xf32>,
    %c239_i32_66 = arith.constant 239 : i32
    %85 = tpu.dynamic_rotate %45 by %c239_i32_66 dim 1 : vector<8x256xf32>, i32 -> vector<8x256xf32>
    %c8_67 = arith.constant 8 : index
    %c0_68 = arith.constant 0 : index
    %86 = vector.load %arg1[%c8_67, %c0_68] : memref<9x256xf32, #tpu.memory_space<vmem>>, vector<1x256xf32>
    %87 = vector.broadcast %86 : vector<1x256xf32> to vector<8x256xf32>
    %88 = arith.mulf %85, %87 : vector<8x256xf32>
    %c64_69 = arith.constant 64 : index
    %c0_70 = arith.constant 0 : index
    %89 = vector.load %arg11[%c64_69, %c0_70] : memref<72x256xf32, #tpu.memory_space<vmem>>, vector<8x256xf32>
    tpu.vector_store %arg11[%c64_69, %c0_70], %88 {strides = array<i32>} : memref<72x256xf32, #tpu.memory_space<vmem>>, vector<8x256xf32>,
    %c0_71 = arith.constant 0 : index
    %c0_72 = arith.constant 0 : index
    %90 = vector.load %arg11[%c0_71, %c0_72] : memref<72x256xf32, #tpu.memory_space<vmem>>, vector<72x256xf32>
    %c0_73 = arith.constant 0 : index
    %c0_74 = arith.constant 0 : index
    %91 = vector.load %arg4[%c0_73, %c0_74] : memref<8x72xf32, #tpu.memory_space<vmem>>, vector<8x72xf32>
    %cst_75 = arith.constant dense<0.000000e+00> : vector<8x256xf32>
    %92 = tpu.matmul %91, %90, %cst_75 {dimension_numbers = #tpu.dot_dimension_numbers<[1], [0], [0], [1], [0, 0, 1, 1], [], []>} : vector<8x72xf32>, vector<72x256xf32>, vector<8x256xf32> -> vector<8x256xf32>
    %c0_76 = arith.constant 0 : index
    %c0_77 = arith.constant 0 : index
    %93 = vector.load %arg5[%c0_76, %c0_77] : memref<8x1xf32, #tpu.memory_space<vmem>>, vector<8x1xf32>
    %c0_78 = arith.constant 0 : index
    %c0_79 = arith.constant 0 : index
    %94 = vector.load %arg6[%c0_78, %c0_79] : memref<8x1xf32, #tpu.memory_space<vmem>>, vector<8x1xf32>
    %cst_80 = arith.constant dense<0.000000e+00> : vector<8xf32>
    %95 = vector.multi_reduction <add>, %92, %cst_80 [1] : vector<8x256xf32> to vector<8xf32>
    %96 = vector.shape_cast %95 : vector<8xf32> to vector<8x1xf32>
    %cst_81 = arith.constant 3.906250e-03 : f32
    %97 = vector.broadcast %cst_81 : f32 to vector<8x1xf32>
    %98 = arith.mulf %96, %97 : vector<8x1xf32>
    %99 = vector.broadcast %98 : vector<8x1xf32> to vector<8x256xf32>
    %100 = arith.subf %92, %99 : vector<8x256xf32>
    %101 = arith.mulf %100, %100 : vector<8x256xf32>
    %cst_82 = arith.constant dense<0.000000e+00> : vector<8xf32>
    %102 = vector.multi_reduction <add>, %101, %cst_82 [1] : vector<8x256xf32> to vector<8xf32>
    %103 = vector.shape_cast %102 : vector<8xf32> to vector<8x1xf32>
    %cst_83 = arith.constant 3.906250e-03 : f32
    %104 = vector.broadcast %cst_83 : f32 to vector<8x1xf32>
    %105 = arith.mulf %103, %104 : vector<8x1xf32>
    %cst_84 = arith.constant 9.99999974E-6 : f32
    %106 = vector.broadcast %cst_84 : f32 to vector<8x1xf32>
    %107 = arith.addf %105, %106 : vector<8x1xf32>
    %108 = math.rsqrt %107 : vector<8x1xf32>
    %109 = arith.mulf %93, %108 : vector<8x1xf32>
    %110 = vector.broadcast %109 : vector<8x1xf32> to vector<8x256xf32>
    %111 = arith.mulf %100, %110 : vector<8x256xf32>
    %112 = vector.broadcast %94 : vector<8x1xf32> to vector<8x256xf32>
    %113 = arith.addf %111, %112 : vector<8x256xf32>
    %cst_85 = arith.constant 0.000000e+00 : f32
    %114 = vector.broadcast %cst_85 : f32 to vector<8x256xf32>
    %115 = arith.maximumf %113, %114 : vector<8x256xf32>
    %c17_i32_86 = arith.constant 17 : i32
    %116 = tpu.dynamic_rotate %115 by %c17_i32_86 dim 1 : vector<8x256xf32>, i32 -> vector<8x256xf32>
    %c0_87 = arith.constant 0 : index
    %c0_88 = arith.constant 0 : index
    %117 = vector.load %arg1[%c0_87, %c0_88] : memref<9x256xf32, #tpu.memory_space<vmem>>, vector<1x256xf32>
    %118 = vector.broadcast %117 : vector<1x256xf32> to vector<8x256xf32>
    %119 = arith.mulf %116, %118 : vector<8x256xf32>
    %c0_89 = arith.constant 0 : index
    %c0_90 = arith.constant 0 : index
    %120 = vector.load %arg11[%c0_89, %c0_90] : memref<72x256xf32, #tpu.memory_space<vmem>>, vector<8x256xf32>
    tpu.vector_store %arg11[%c0_89, %c0_90], %119 {strides = array<i32>} : memref<72x256xf32, #tpu.memory_space<vmem>>, vector<8x256xf32>,
    %c16_i32_91 = arith.constant 16 : i32
    %121 = tpu.dynamic_rotate %115 by %c16_i32_91 dim 1 : vector<8x256xf32>, i32 -> vector<8x256xf32>
    %c1_92 = arith.constant 1 : index
    %c0_93 = arith.constant 0 : index
    %122 = vector.load %arg1[%c1_92, %c0_93] : memref<9x256xf32, #tpu.memory_space<vmem>>, vector<1x256xf32>
    %123 = vector.broadcast %122 : vector<1x256xf32> to vector<8x256xf32>
    %124 = arith.mulf %121, %123 : vector<8x256xf32>
    %c8_94 = arith.constant 8 : index
    %c0_95 = arith.constant 0 : index
    %125 = vector.load %arg11[%c8_94, %c0_95] : memref<72x256xf32, #tpu.memory_space<vmem>>, vector<8x256xf32>
    tpu.vector_store %arg11[%c8_94, %c0_95], %124 {strides = array<i32>} : memref<72x256xf32, #tpu.memory_space<vmem>>, vector<8x256xf32>,
    %c15_i32_96 = arith.constant 15 : i32
    %126 = tpu.dynamic_rotate %115 by %c15_i32_96 dim 1 : vector<8x256xf32>, i32 -> vector<8x256xf32>
    %c2_97 = arith.constant 2 : index
    %c0_98 = arith.constant 0 : index
    %127 = vector.load %arg1[%c2_97, %c0_98] : memref<9x256xf32, #tpu.memory_space<vmem>>, vector<1x256xf32>
    %128 = vector.broadcast %127 : vector<1x256xf32> to vector<8x256xf32>
    %129 = arith.mulf %126, %128 : vector<8x256xf32>
    %c16_99 = arith.constant 16 : index
    %c0_100 = arith.constant 0 : index
    %130 = vector.load %arg11[%c16_99, %c0_100] : memref<72x256xf32, #tpu.memory_space<vmem>>, vector<8x256xf32>
    tpu.vector_store %arg11[%c16_99, %c0_100], %129 {strides = array<i32>} : memref<72x256xf32, #tpu.memory_space<vmem>>, vector<8x256xf32>,
    %c1_i32_101 = arith.constant 1 : i32
    %131 = tpu.dynamic_rotate %115 by %c1_i32_101 dim 1 : vector<8x256xf32>, i32 -> vector<8x256xf32>
    %c3_102 = arith.constant 3 : index
    %c0_103 = arith.constant 0 : index
    %132 = vector.load %arg1[%c3_102, %c0_103] : memref<9x256xf32, #tpu.memory_space<vmem>>, vector<1x256xf32>
    %133 = vector.broadcast %132 : vector<1x256xf32> to vector<8x256xf32>
    %134 = arith.mulf %131, %133 : vector<8x256xf32>
    %c24_104 = arith.constant 24 : index
    %c0_105 = arith.constant 0 : index
    %135 = vector.load %arg11[%c24_104, %c0_105] : memref<72x256xf32, #tpu.memory_space<vmem>>, vector<8x256xf32>
    tpu.vector_store %arg11[%c24_104, %c0_105], %134 {strides = array<i32>} : memref<72x256xf32, #tpu.memory_space<vmem>>, vector<8x256xf32>,
    %c32_106 = arith.constant 32 : index
    %c0_107 = arith.constant 0 : index
    %136 = vector.load %arg11[%c32_106, %c0_107] : memref<72x256xf32, #tpu.memory_space<vmem>>, vector<8x256xf32>
    tpu.vector_store %arg11[%c32_106, %c0_107], %115 {strides = array<i32>} : memref<72x256xf32, #tpu.memory_space<vmem>>, vector<8x256xf32>,
    %c255_i32_108 = arith.constant 255 : i32
    %137 = tpu.dynamic_rotate %115 by %c255_i32_108 dim 1 : vector<8x256xf32>, i32 -> vector<8x256xf32>
    %c5_109 = arith.constant 5 : index
    %c0_110 = arith.constant 0 : index
    %138 = vector.load %arg1[%c5_109, %c0_110] : memref<9x256xf32, #tpu.memory_space<vmem>>, vector<1x256xf32>
    %139 = vector.broadcast %138 : vector<1x256xf32> to vector<8x256xf32>
    %140 = arith.mulf %137, %139 : vector<8x256xf32>
    %c40_111 = arith.constant 40 : index
    %c0_112 = arith.constant 0 : index
    %141 = vector.load %arg11[%c40_111, %c0_112] : memref<72x256xf32, #tpu.memory_space<vmem>>, vector<8x256xf32>
    tpu.vector_store %arg11[%c40_111, %c0_112], %140 {strides = array<i32>} : memref<72x256xf32, #tpu.memory_space<vmem>>, vector<8x256xf32>,
    %c241_i32_113 = arith.constant 241 : i32
    %142 = tpu.dynamic_rotate %115 by %c241_i32_113 dim 1 : vector<8x256xf32>, i32 -> vector<8x256xf32>
    %c6_114 = arith.constant 6 : index
    %c0_115 = arith.constant 0 : index
    %143 = vector.load %arg1[%c6_114, %c0_115] : memref<9x256xf32, #tpu.memory_space<vmem>>, vector<1x256xf32>
    %144 = vector.broadcast %143 : vector<1x256xf32> to vector<8x256xf32>
    %145 = arith.mulf %142, %144 : vector<8x256xf32>
    %c48_116 = arith.constant 48 : index
    %c0_117 = arith.constant 0 : index
    %146 = vector.load %arg11[%c48_116, %c0_117] : memref<72x256xf32, #tpu.memory_space<vmem>>, vector<8x256xf32>
    tpu.vector_store %arg11[%c48_116, %c0_117], %145 {strides = array<i32>} : memref<72x256xf32, #tpu.memory_space<vmem>>, vector<8x256xf32>,
    %c240_i32_118 = arith.constant 240 : i32
    %147 = tpu.dynamic_rotate %115 by %c240_i32_118 dim 1 : vector<8x256xf32>, i32 -> vector<8x256xf32>
    %c7_119 = arith.constant 7 : index
    %c0_120 = arith.constant 0 : index
    %148 = vector.load %arg1[%c7_119, %c0_120] : memref<9x256xf32, #tpu.memory_space<vmem>>, vector<1x256xf32>
    %149 = vector.broadcast %148 : vector<1x256xf32> to vector<8x256xf32>
    %150 = arith.mulf %147, %149 : vector<8x256xf32>
    %c56_121 = arith.constant 56 : index
    %c0_122 = arith.constant 0 : index
    %151 = vector.load %arg11[%c56_121, %c0_122] : memref<72x256xf32, #tpu.memory_space<vmem>>, vector<8x256xf32>
    tpu.vector_store %arg11[%c56_121, %c0_122], %150 {strides = array<i32>} : memref<72x256xf32, #tpu.memory_space<vmem>>, vector<8x256xf32>,
    %c239_i32_123 = arith.constant 239 : i32
    %152 = tpu.dynamic_rotate %115 by %c239_i32_123 dim 1 : vector<8x256xf32>, i32 -> vector<8x256xf32>
    %c8_124 = arith.constant 8 : index
    %c0_125 = arith.constant 0 : index
    %153 = vector.load %arg1[%c8_124, %c0_125] : memref<9x256xf32, #tpu.memory_space<vmem>>, vector<1x256xf32>
    %154 = vector.broadcast %153 : vector<1x256xf32> to vector<8x256xf32>
    %155 = arith.mulf %152, %154 : vector<8x256xf32>
    %c64_126 = arith.constant 64 : index
    %c0_127 = arith.constant 0 : index
    %156 = vector.load %arg11[%c64_126, %c0_127] : memref<72x256xf32, #tpu.memory_space<vmem>>, vector<8x256xf32>
    tpu.vector_store %arg11[%c64_126, %c0_127], %155 {strides = array<i32>} : memref<72x256xf32, #tpu.memory_space<vmem>>, vector<8x256xf32>,
    %c0_128 = arith.constant 0 : index
    %c0_129 = arith.constant 0 : index
    %157 = vector.load %arg11[%c0_128, %c0_129] : memref<72x256xf32, #tpu.memory_space<vmem>>, vector<72x256xf32>
    %c0_130 = arith.constant 0 : index
    %c0_131 = arith.constant 0 : index
    %158 = vector.load %arg7[%c0_130, %c0_131] : memref<8x72xf32, #tpu.memory_space<vmem>>, vector<8x72xf32>
    %cst_132 = arith.constant dense<0.000000e+00> : vector<8x256xf32>
    %159 = tpu.matmul %158, %157, %cst_132 {dimension_numbers = #tpu.dot_dimension_numbers<[1], [0], [0], [1], [0, 0, 1, 1], [], []>} : vector<8x72xf32>, vector<72x256xf32>, vector<8x256xf32> -> vector<8x256xf32>
    %c0_133 = arith.constant 0 : index
    %c0_134 = arith.constant 0 : index
    %160 = vector.load %arg8[%c0_133, %c0_134] : memref<8x1xf32, #tpu.memory_space<vmem>>, vector<8x1xf32>
    %c0_135 = arith.constant 0 : index
    %c0_136 = arith.constant 0 : index
    %161 = vector.load %arg9[%c0_135, %c0_136] : memref<8x1xf32, #tpu.memory_space<vmem>>, vector<8x1xf32>
    %cst_137 = arith.constant dense<0.000000e+00> : vector<8xf32>
    %162 = vector.multi_reduction <add>, %159, %cst_137 [1] : vector<8x256xf32> to vector<8xf32>
    %163 = vector.shape_cast %162 : vector<8xf32> to vector<8x1xf32>
    %cst_138 = arith.constant 3.906250e-03 : f32
    %164 = vector.broadcast %cst_138 : f32 to vector<8x1xf32>
    %165 = arith.mulf %163, %164 : vector<8x1xf32>
    %166 = vector.broadcast %165 : vector<8x1xf32> to vector<8x256xf32>
    %167 = arith.subf %159, %166 : vector<8x256xf32>
    %168 = arith.mulf %167, %167 : vector<8x256xf32>
    %cst_139 = arith.constant dense<0.000000e+00> : vector<8xf32>
    %169 = vector.multi_reduction <add>, %168, %cst_139 [1] : vector<8x256xf32> to vector<8xf32>
    %170 = vector.shape_cast %169 : vector<8xf32> to vector<8x1xf32>
    %cst_140 = arith.constant 3.906250e-03 : f32
    %171 = vector.broadcast %cst_140 : f32 to vector<8x1xf32>
    %172 = arith.mulf %170, %171 : vector<8x1xf32>
    %cst_141 = arith.constant 9.99999974E-6 : f32
    %173 = vector.broadcast %cst_141 : f32 to vector<8x1xf32>
    %174 = arith.addf %172, %173 : vector<8x1xf32>
    %175 = math.rsqrt %174 : vector<8x1xf32>
    %176 = arith.mulf %160, %175 : vector<8x1xf32>
    %177 = vector.broadcast %176 : vector<8x1xf32> to vector<8x256xf32>
    %178 = arith.mulf %167, %177 : vector<8x256xf32>
    %179 = vector.broadcast %161 : vector<8x1xf32> to vector<8x256xf32>
    %180 = arith.addf %178, %179 : vector<8x256xf32>
    %c0_142 = arith.constant 0 : index
    %c0_143 = arith.constant 0 : index
    %c0_144 = arith.constant 0 : index
    %181 = vector.load %arg10[%c0_142, %c0_143, %c0_144] : memref<1x8x256xf32, #tpu.memory_space<vmem>>, vector<1x8x256xf32>
    %182 = vector.shape_cast %181 : vector<1x8x256xf32> to vector<8x256xf32>
    %183 = arith.addf %182, %180 : vector<8x256xf32>
    %c0_145 = arith.constant 0 : index
    %c0_146 = arith.constant 0 : index
    %c0_147 = arith.constant 0 : index
    %184 = vector.load %arg10[%c0_145, %c0_146, %c0_147] : memref<1x8x256xf32, #tpu.memory_space<vmem>>, vector<1x8x256xf32>
    %185 = vector.shape_cast %184 : vector<1x8x256xf32> to vector<8x256xf32>
    %186 = vector.shape_cast %183 : vector<8x256xf32> to vector<1x8x256xf32>
    tpu.vector_store %arg10[%c0_145, %c0_146, %c0_147], %186 {strides = array<i32>} : memref<1x8x256xf32, #tpu.memory_space<vmem>>, vector<1x8x256xf32>,
    return
  }
  func.func @transform_0(%arg0: i32) -> (i32, i32) {
    %c0_i32 = arith.constant 0 : i32
    %c0_i32_0 = arith.constant 0 : i32
    %c0_i32_1 = arith.constant 0 : i32
    return %c0_i32, %c0_i32_0 : i32, i32
  }
  func.func @transform_1(%arg0: i32) -> (i32, i32, i32) {
    %c0_i32 = arith.constant 0 : i32
    %c0_i32_0 = arith.constant 0 : i32
    %c0_i32_1 = arith.constant 0 : i32
    return %arg0, %c0_i32, %c0_i32_0 : i32, i32, i32
  }
  func.func @transform_2(%arg0: i32) -> (i32, i32) {
    %c0_i32 = arith.constant 0 : i32
    %c0_i32_0 = arith.constant 0 : i32
    %c0_i32_1 = arith.constant 0 : i32
    return %c0_i32, %c0_i32_0 : i32, i32
  }
  func.func @transform_3(%arg0: i32) -> (i32, i32) {
    %c0_i32 = arith.constant 0 : i32
    %c0_i32_0 = arith.constant 0 : i32
    %c0_i32_1 = arith.constant 0 : i32
    return %c0_i32, %c0_i32_0 : i32, i32
  }
  func.func @transform_4(%arg0: i32) -> (i32, i32) {
    %c0_i32 = arith.constant 0 : i32
    %c0_i32_0 = arith.constant 0 : i32
    %c0_i32_1 = arith.constant 0 : i32
    return %c0_i32, %c0_i32_0 : i32, i32
  }
  func.func @transform_5(%arg0: i32) -> (i32, i32) {
    %c0_i32 = arith.constant 0 : i32
    %c0_i32_0 = arith.constant 0 : i32
    %c0_i32_1 = arith.constant 0 : i32
    return %c0_i32, %c0_i32_0 : i32, i32
  }
  func.func @transform_6(%arg0: i32) -> (i32, i32) {
    %c0_i32 = arith.constant 0 : i32
    %c0_i32_0 = arith.constant 0 : i32
    %c0_i32_1 = arith.constant 0 : i32
    return %c0_i32, %c0_i32_0 : i32, i32
  }
  func.func @transform_7(%arg0: i32) -> (i32, i32) {
    %c0_i32 = arith.constant 0 : i32
    %c0_i32_0 = arith.constant 0 : i32
    %c0_i32_1 = arith.constant 0 : i32
    return %c0_i32, %c0_i32_0 : i32, i32
  }
  func.func @transform_8(%arg0: i32) -> (i32, i32) {
    %c0_i32 = arith.constant 0 : i32
    %c0_i32_0 = arith.constant 0 : i32
    %c0_i32_1 = arith.constant 0 : i32
    return %c0_i32, %c0_i32_0 : i32, i32
  }
  func.func @transform_9(%arg0: i32) -> (i32, i32, i32) {
    %c0_i32 = arith.constant 0 : i32
    %c0_i32_0 = arith.constant 0 : i32
    %c0_i32_1 = arith.constant 0 : i32
    return %arg0, %c0_i32, %c0_i32_0 : i32, i32, i32
  }
}

</mosaic_0001>

<bundles_post_ra>
// kernel: tpu_custom_call.1
= control target key start
LH: loop header
LB: loop body
LE: loop exit
PB: predicated region body
PF: predicated region fallthrough
CT: control target
= control target key end

     0   :  { %s2293_s0 = inlined_call_operand.vmem [shape: f32[9,256], index: 0, kind: input, shape index: {}]   ;;  %s2294_s1 = inlined_call_operand.hbm [shape: f32[2,8,256], index: 1, kind: input, shape index: {}]   ;;  %s2295_s2 = inlined_call_operand.vmem [shape: f32[8,72], index: 2, kind: input, shape index: {}]   ;;  %s2296_s3 = inlined_call_operand.hbm [shape: f32[8,72], index: 3, kind: input, shape index: {}]   ;;  %s2297_s4 = inlined_call_operand.vmem [shape: f32[8,1], index: 4, kind: input, shape index: {}]   ;;  %s2298_s5 = inlined_call_operand.vmem [shape: f32[8,1], index: 5, kind: input, shape index: {}]   ;;  %s2299_s6 = inlined_call_operand.vmem [shape: f32[8,72], index: 6, kind: input, shape index: {}]   ;;  %s2300_s7 = inlined_call_operand.vmem [shape: f32[8,1], index: 7, kind: input, shape index: {}]   ;;  %s2301_s8 = inlined_call_operand.vmem [shape: f32[8,1], index: 8, kind: input, shape index: {}]   ;;  %s2302_s9 = inlined_call_operand.hbm [shape: f32[2,8,256], index: 9, kind: output, shape index: {}]  }
   0x1   :  { %2311 = sst [smem:[#allocation12_spill]] %s2296_s3 }
   0x2   :  { %14 = vsyncpa [#allocation4], 0 }
   0x3   :  { %16 = vsyncpa [#allocation4 + $0x1], 0 }
   0x4   :  { %17 = vsyncpa [#allocation7], 0 }
   0x5   :  { %18 = vsyncpa [#allocation5], 0 }
   0x6   :  { %20 = vsyncpa [#allocation5 + $0x1], 0  ;;  %s1718_s30 = smov 0   ;;  %s1720_s10 = smov 0  }
   0x7   :  { %s1722_s11 = smov 0   ;;  %s1724_s12 = smov 0  }
   0x8 LB: > { %s1739_s13 = sadd.s32 4294967295, %s1653_s12   ;;  %s1362_s14 = sadd.s32 4294967294, %s1653_s12   ;;  %s1653_s12 = sphi %s1724_s12, %s2336_s12   ;;  %s1649_s11 = sphi %s1722_s11, %s2335_s11   ;;  %s1645_s10 = sphi %s1720_s10, %s2334_s10   ;;  %s1641_s30 = sphi %s1718_s30, %s2333_s30  }
   0x9   : > { %p67_p0 = scmp.ne.s32.totalorder %s1645_s10, %s1641_s30  ;;  %p2303_p1 = scmp.eq.s32.totalorder %s1739_s13, 0 }
   0xa   : > { %p244_p3 = scmp.eq.s32.totalorder %s1362_s14, 1  ;;  %p1363_p5 = scmp.ge.s32.totalorder %s1653_s12, 1 }
   0xb   : > { %p1748_p4 = por %p2303_p1, %p67_p0  ;;  %p251_p7 = scmp.lt.s32.totalorder %s1653_s12, 3 }
   0xc   : > { %p1753_p6 = por %p244_p3, %p67_p0  ;;  %s1655_s18 = smov [#allocation6]  }
   0xd   : > { %s2312_s15 = scalar_select %p1748_p4, 1, 0 }
   0xe   : > { %s2313_s16 = scalar_select %p1753_p6, 1, 0 }
   0xf   : > { %p1758_p8 = pnand %p1363_p5, %p251_p7  ;;  %s270_s19 = sshll.u32 %s1655_s18, 4  ;;  %s271_s19 = int_to_ptr.vmem [resolvable:$true] %s270_s19 }
  0x10   : > { %s1766_s20 = sadd.s32 1, %s1653_s12   ;;  %s54_s24 = sadd.s32 1, %s1649_s11 }
  0x11   : > { %s2314_s17 = scalar_select %p1758_p8, 1, 0 }
  0x12   : > { %p1460_p10 = pneg %p1758_p8  ;;  %s51_s22 = ssub.s32 %s1653_s12, %s1766_s20 }
  0x13   : > { %p1776_p12 = scmp.eq.s32.totalorder %s51_s22, 0  ;;  %s2317_s3 = sld [smem:[#allocation12_spill]] }
  0x14   : > { %p1770_p11 = pnand %p1460_p10, %p2303_p1 }
  0x15   : > { %s2316_s23 = scalar_select %p1776_p12, 1, 0 }
  0x16   : > { %p1527_p3 = pneg %p1770_p11 }
  0x19   : > { %s1525_s27 = scalar_lea.hbm %s2317_s3, 128 }
  0x1a   : > { %p1526_p0 = scmp.ne.s32.totalorder %s2317_s3, %s1525_s27  ;;  %p1532_p10 = scmp.lt.u32.totalorder %s1525_s27, %s2317_s3 }
  0x1c   : > { %p1528_p5 = pnand %p1527_p3, %p1526_p0 }
  0x1e   : > { %p1529_p7 = pneg %p1528_p5 }
  0x20   : > { %p1534_p9 = pnand %p1532_p10, %p1529_p7 }
  0x22   : > { %1537 = shalt.err (!%p1534_p9)
}
  0x23   : > { %s1538_s22 = scalar_lea.vmem %s271_s19, 128  ;;  %p1546_p6 = scmp.lt.s32.totalorder %s271_s19, %s271_s19 }
  0x24   : > { %p1539_p1 = scmp.ne.s32.totalorder %s271_s19, %s1538_s22  ;;  %p1547_p4 = scmp.lt.s32.totalorder %s1538_s22, %s1538_s22 }
  0x26   : > { %p1541_p2 = pnand %p1539_p1, %p1527_p3  ;;  %p1548_p8 = por %p1547_p4, %p1546_p6 }
  0x28   : > { %p1542_p13 = pneg %p1541_p2 }
  0x2a   : > { %p1549_p12 = pnand %p1548_p8, %p1542_p13 }
  0x2c   : > { %1552 = shalt.err (!%p1549_p12)
}
  0x2d   : > { %1463 = dma.hbm_to_vmem [thread:$0]  (!%p1770_p11), %s2317_s3, 128, %s271_s19, [#allocation7]  }
  0x2e   : > { %p2318_p1 = scmp.ne.s32.totalorder %s2316_s23, 0  ;;  %p62_p2 = scmp.eq.s32.totalorder %s1653_s12, 0 }
  0x2f   : > { %p2319_p4 = scmp.ne.s32.totalorder %s1649_s11, %s1645_s10  ;;  %p2320_p6 = scmp.eq.s32.totalorder %s1739_s13, 1 }
  0x30   : > { %s1802_s27 = scalar_select %p2318_p1, %s1649_s11, %s54_s24  }
  0x31   : > { %p1810_p8 = por %p2320_p6, %p2319_p4  ;;  %p1473_p9 = scmp.lt.s32.totalorder %s1653_s12, 2 }
  0x32   : > { %s296_s28 = sand.u32 1, %s1649_s11   ;;  %p2322_p12 = pmov %p2319_p4 }
  0x33   : > { %s1366_s29 = sshll.u32 %s296_s28, 4  ;;  %s1402_s14 = sshll.u32 %s1653_s12, 8 }
  0x34   : > { %p63_p13 = por %p62_p2, %p2322_p12  ;;  %s1823_s19 = scalar_lea.hbm %s2294_s1, %s1402_s14 }
  0x35   : > { %s300_s23 = scalar_lea.vmem [#allocation3], %s1366_s29  ;;  %s297_s26 = scalar_lea.sflag [#allocation4], %s296_s28 }
  0x36   : > { %s308_s24 = sshll.u32 %s300_s23, 4  ;;  %p1825_p11 = pnand %p1473_p9, %p63_p13  ;;  %s1829_s24 = int_to_ptr.vmem [resolvable:$true] %s308_s24 }
  0x37   : > { %s1553_s3 = scalar_lea.hbm %s1823_s19, 256  ;;  %s1558_s18 = scalar_lea.hbm %s2294_s1, 512 }
  0x38   : > { %p1554_p0 = scmp.ne.s32.totalorder %s1823_s19, %s1553_s3  ;;  %p1555_p3 = pneg %p1825_p11 }
  0x39   : > { %p1559_p10 = scmp.lt.u32.totalorder %s1823_s19, %s2294_s1  ;;  %p1560_p1 = scmp.lt.u32.totalorder %s1558_s18, %s1553_s3 }
  0x3a   : > { %p1556_p5 = pnand %p1555_p3, %p1554_p0  ;;  %p1562_p4 = scmp.lt.u32.totalorder %s1553_s3, %s1823_s19 }
  0x3b   : > { %p1561_p2 = por %p1560_p1, %p1559_p10 }
  0x3c   : > { %p1557_p7 = pneg %p1556_p5 }
  0x3d   : > { %p1563_p6 = por %p1562_p4, %p1561_p2 }
  0x3f   : > { %p1564_p9 = pnand %p1563_p6, %p1557_p7 }
  0x41   : > { %1567 = shalt.err (!%p1564_p9)
}
  0x42   : > { %s1568_s28 = scalar_lea.vmem %s1829_s24, 256  ;;  %s1656_s14 = smov [#allocation3]  }
  0x43   : > { %p1569_p12 = scmp.ne.s32.totalorder %s1829_s24, %s1568_s28  ;;  %s1573_s29 = sshll.u32 %s1656_s14, 4  ;;  %s1574_s29 = int_to_ptr.vmem [resolvable:$false] %s1573_s29 }
  0x44   : > { %s1575_s22 = scalar_lea.vmem %s1574_s29, 512  ;;  %p1576_p5 = scmp.lt.s32.totalorder %s1829_s24, %s1574_s29 }
  0x45   : > { %p1571_p13 = pnand %p1569_p12, %p1555_p3  ;;  %p1577_p10 = scmp.lt.s32.totalorder %s1575_s22, %s1568_s28 }
  0x47   : > { %p1572_p0 = pneg %p1571_p13  ;;  %p1578_p1 = por %p1577_p10, %p1576_p5 }
  0x49   : > { %p1579_p2 = pnand %p1578_p1, %p1572_p0 }
  0x4b   : > { %1582 = shalt.err (!%p1579_p2)
}
  0x4c   : > { %1467 = dma.hbm_to_vmem [thread:$0]  (!%p1825_p11), %s1823_s19, 256, %s1829_s24, %s297_s26  }
  0x4d   : > { %p2324_p7 = scmp.ne.s32.totalorder %s2314_s17, 0 }
  0x4e   : > { %s1859_s3 = sand.u32 (!%p2324_p7), 1, %s1645_s10   ;;  %p2325_p3 = scmp.ne.s32.totalorder (!%p2324_p7), %s2312_s15, 0 }
  0x4f   : > { %317 = sbr.rel (%p2324_p7) target bundleno = 2096 (0x830), region = 56  ;;  %s2306_s18 = sshll.u32 (!%p2324_p7), %s1859_s3, 4 }
  0x50   : > { %s320_s23 = scalar_lea.sflag (!%p2324_p7), [#allocation4], %s1859_s3  ;;  %s323_s28 = scalar_lea.vmem (!%p2324_p7), [#allocation3], %s2306_s18 }
  0x56   : > { %1628 = dma.done.wait (%p2325_p3), %s320_s23, 256  }
  0x57   : > { %1630 = vsyncadd (%p2325_p3), %s320_s23, 4294967040  ;;  %p2326_p11 = scmp.eq.s32.totalorder %s1739_s13, 0 }
  0x59   : > { %1632 = dma.done.wait (%p2326_p11), [#allocation7], 128   ;;  %p2327_p4 = pmov %p2326_p11 }
  0x5a   : > { %v1873_v0 = vld [vmem:[%s323_s28] sm:$0xff]  ;;  %s1657_s17 = smov 16   ;;  %s1658_s19 = smov 17   ;;  %v1879_v1 = vld [vmem:[%s323_s28 + $0x8] sm:$0xff]  ;;  %v1663_v2 = vmov 0.0   ;;  %v368_v3 = vlaneseq  ;;  %vm578_vm8 = vcmask 588800  }
  0x5b   : > { %1634 = vsyncadd (%p2327_p4), [#allocation7], 4294967168  ;;  %389 = vrot.lane.b32.xlu1 %v1873_v0, %s1657_s17  ;;  %364 = vrot.lane.b32.xlu0 %v1873_v0, %s1658_s19  ;;  %s2307_s15 = smov 15   ;;  %s1660_s24 = smov 1  }
  0x5c   : > { %s1661_s25 = smov 127   ;;  %s1662_s26 = smov 113   ;;  %646 = vmatprep.mubr.f32.mxu0 %v1663_v2  ;;  %919 = vmatprep.mubr.f32.mxu1 %v1663_v2  ;;  %v376_v4 = vshrl.u32 %v368_v3, 7  ;;  %v1911_v5 = vand.u32 127, %v368_v3 }
  0x5d   : > { %s1664_s14 = smov 112   ;;  %s2309_s29 = smov 111   ;;  %v1373_v8 = vld [vmem:[%s2293_s0 + $0x1] ss:$8 sm:$0x3] }
  0x5e   : > { %v1913_v6 = vsub.s32 0, %v376_v4  ;;  %v1915_v7 = vsub.s32 1, %v376_v4  ;;  %v373_v9 = vld [vmem:[%s2293_s0] ss:$8 sm:$0x3]  ;;  %vm393_vm0 = vcmp.lt.s32.totalorder %v1911_v5, 16 }
  0x5f   : > { %391 = vrot.lane.b32.xlu1 %v1879_v1, %s1657_s17  ;;  %366 = vrot.lane.b32.xlu0 %v1879_v1, %s1658_s19  ;;  %vm370_vm1 = vcmp.lt.s32.totalorder %v1911_v5, 17  ;;  %v1374_v26 = vld [vmem:[%s2293_s0 + $0x2] ss:$8 sm:$0x3]  ;;  %vm417_vm2 = vcmp.lt.s32.totalorder %v1911_v5, 15  ;;  %vm441_vm3 = vcmp.lt.s32.totalorder %v1911_v5, 1 }
  0x60   : > { %v402_v12 = vrot.slane %v1373_v8, %v1913_v6  ;;  %v378_v13 = vrot.slane %v373_v9, %v1913_v6  ;;  %v382_v14 = vrot.slane %v373_v9, %v1915_v7  ;;  %v406_v15 = vrot.slane %v1373_v8, %v1915_v7  ;;  %v1375_v27 = vld [vmem:[%s2293_s0 + $0x3] ss:$8 sm:$0x3]  ;;  %v1376_v36 = vld [vmem:[%s2293_s0 + $0x5] ss:$8 sm:$0x3] }
  0x61   : > { %v426_v32 = vrot.slane %v1374_v26, %v1913_v6  ;;  %v430_v33 = vrot.slane %v1374_v26, %v1915_v7  ;;  %v450_v34 = vrot.slane %v1375_v27, %v1913_v6  ;;  %v454_v35 = vrot.slane %v1375_v27, %v1915_v7  ;;  %v1377_v57 = vld [vmem:[%s2293_s0 + $0x6] ss:$8 sm:$0x3]  ;;  %v1378_v58 = vld [vmem:[%s2293_s0 + $0x7] ss:$8 sm:$0x3] }
  0x62   : > { %vm467_vm4 = vcmp.lt.s32.totalorder %v1911_v5, 127  ;;  %v476_v43 = vrot.slane %v1376_v36, %v1913_v6  ;;  %v480_v44 = vrot.slane %v1376_v36, %v1915_v7  ;;  %vm491_vm5 = vcmp.lt.s32.totalorder %v1911_v5, 113  ;;  %v1379_v9 = vld [vmem:[%s2293_s0 + $0x10] ss:$8 sm:$0x3]  ;;  %s2328_s18 = smov 111  }
  0x63   : > { %415 = vrot.lane.b32.xlu1 %v1879_v1, %s2307_s15  ;;  %413 = vrot.lane.b32.xlu0 %v1873_v0, %s2307_s15  ;;  %v500_v63 = vrot.slane %v1377_v57, %v1913_v6  ;;  %v504_v3 = vrot.slane %v1377_v57, %v1915_v7  ;;  %vm515_vm6 = vcmp.lt.s32.totalorder %v1911_v5, 112  ;;  %v524_v4 = vrot.slane %v1378_v58, %v1913_v6  ;;  %s2329_s22 = smov 15  }
  0x64   : > { %v528_v8 = vrot.slane %v1378_v58, %v1915_v7  ;;  %vm539_vm7 = vcmp.lt.s32.totalorder %v1911_v5, 111  ;;  %v1384_v58 = vld [vmem:[%s2293_s0 + $0x5] ss:$8 sm:$0x3] }
  0x67   : > { %439 = vrot.lane.b32.xlu1 %v1879_v1, %s1660_s24  ;;  %437 = vrot.lane.b32.xlu0 %v1873_v0, %s1660_s24 }
  0x6b   : > { %465 = vrot.lane.b32.xlu1 %v1879_v1, %s1661_s25  ;;  %463 = vrot.lane.b32.xlu0 %v1873_v0, %s1661_s25 }
  0x6f   : > { %489 = vrot.lane.b32.xlu1 %v1879_v1, %s1662_s26  ;;  %487 = vrot.lane.b32.xlu0 %v1873_v0, %s1662_s26 }
  0x73   : > { %513 = vrot.lane.b32.xlu1 %v1879_v1, %s1664_s14  ;;  %511 = vrot.lane.b32.xlu0 %v1873_v0, %s1664_s14 }
  0x77   : > { %537 = vrot.lane.b32.xlu1 %v1879_v1, %s2309_s29  ;;  %535 = vrot.lane.b32.xlu0 %v1873_v0, %s2309_s29 }
  0xcd   : > { %v390_v10 = vpop.permute.xlu1 %389  ;;  %v365_v11 = vpop.permute.xlu0 %364 }
  0xd1   : > { %v392_v16 = vpop.permute.xlu1 %391  ;;  %v367_v17 = vpop.permute.xlu0 %366 }
  0xd2   : > { %v394_v18 = vsel %vm393_vm0, %v390_v10, %v392_v16  ;;  %v395_v19 = vsel %vm393_vm0, %v392_v16, %v390_v10  ;;  %v371_v20 = vsel %vm370_vm1, %v365_v11, %v367_v17  ;;  %v372_v21 = vsel %vm370_vm1, %v367_v17, %v365_v11 }
  0xd3   : > { %v409_v22 = vmul.f32 %v402_v12, %v395_v19  ;;  %v385_v23 = vmul.f32 %v378_v13, %v372_v21  ;;  %v386_v24 = vmul.f32 %v382_v14, %v371_v20  ;;  %v410_v25 = vmul.f32 %v406_v15, %v394_v18 }
  0xd4   : > { %v552_v14 = vrot.slane %v1379_v9, %v1915_v7  ;;  %v548_v19 = vrot.slane %v1379_v9, %v1913_v6 }
  0xd5   : > { %v416_v28 = vpop.permute.xlu1 %415  ;;  %v414_v29 = vpop.permute.xlu0 %413  ;;  %v1404_v30 = vpack.c.bf16 %v410_v25, %v386_v24  ;;  %v1406_v31 = vpack.c.bf16 %v409_v22, %v385_v23 }
  0xd6   : > { %v418_v37 = vsel %vm417_vm2, %v414_v29, %v416_v28  ;;  %v419_v38 = vsel %vm417_vm2, %v416_v28, %v414_v29  ;;  %v577_v28 = vld [vmem:[%s2295_s2] sm:$0xff] }
  0xd7   : > { %1405 = vmatprep.subr.bf16.mxu0 %v1404_v30  ;;  %v433_v45 = vmul.f32 %v426_v32, %v419_v38  ;;  %v434_v46 = vmul.f32 %v430_v33, %v418_v37  ;;  %v1381_v32 = vld [vmem:[%s2293_s0 + $0x1] ss:$8 sm:$0x3] }
  0xd8   : > { %1407 = vmatpush1.bf16.msra.mxu0 %v1406_v31  ;;  %v661_v31 = vld [vmem:[%s2293_s0] ss:$8 sm:$0x3]  ;;  %v692_v37 = vrot.slane %v1381_v32, %v1915_v7 }
  0xd9   : > { %v440_v39 = vpop.permute.xlu1 %439  ;;  %v438_v40 = vpop.permute.xlu0 %437  ;;  %v670_v36 = vrot.slane %v661_v31, %v1915_v7 }
  0xda   : > { %v442_v41 = vsel %vm441_vm3, %v438_v40, %v440_v39  ;;  %v443_v42 = vsel %vm441_vm3, %v440_v39, %v438_v40 }
  0xdb   : > { %v457_v47 = vmul.f32 %v450_v34, %v443_v42  ;;  %v458_v48 = vmul.f32 %v454_v35, %v442_v41  ;;  %v666_v34 = vrot.slane %v661_v31, %v1913_v6  ;;  %v688_v35 = vrot.slane %v1381_v32, %v1913_v6 }
  0xdd   : > { %v466_v49 = vpop.permute.xlu1 %465  ;;  %v464_v50 = vpop.permute.xlu0 %463  ;;  %v1408_v51 = vpack.c.bf16 %v458_v48, %v434_v46  ;;  %v1410_v52 = vpack.c.bf16 %v457_v47, %v433_v45 }
  0xde   : > { %v468_v53 = vsel %vm467_vm4, %v464_v50, %v466_v49  ;;  %v469_v54 = vsel %vm467_vm4, %v466_v49, %v464_v50  ;;  %v1382_v49 = vld [vmem:[%s2293_s0 + $0x2] ss:$8 sm:$0x3]  ;;  %v1383_v50 = vld [vmem:[%s2293_s0 + $0x3] ss:$8 sm:$0x3] }
  0xdf   : > { %v483_v55 = vmul.f32 %v476_v43, %v468_v53  ;;  %v484_v56 = vmul.f32 %v480_v44, %v469_v54  ;;  %1409 = vmatprep.subr.bf16.mxu0 %v1408_v51  ;;  %v710_v54 = vrot.slane %v1382_v49, %v1913_v6  ;;  %v736_v57 = vrot.slane %v1383_v50, %v1915_v7 }
  0xe0   : > { %1411 = vmatpush1.bf16.msra.mxu0 %v1410_v52 }
  0xe1   : > { %v490_v59 = vpop.permute.xlu1 %489  ;;  %v488_v60 = vpop.permute.xlu0 %487  ;;  %v1412_v61 = vpack.c.bf16 %v484_v56, %v1879_v1  ;;  %v1414_v62 = vpack.c.bf16 %v483_v55, %v1873_v0  ;;  %v714_v55 = vrot.slane %v1382_v49, %v1915_v7  ;;  %v732_v56 = vrot.slane %v1383_v50, %v1913_v6 }
  0xe2   : > { %v492_v1 = vsel %vm491_vm5, %v488_v60, %v490_v59  ;;  %v493_v0 = vsel %vm491_vm5, %v490_v59, %v488_v60 }
  0xe3   : > { %1413 = vmatprep.subr.bf16.mxu0 %v1412_v61  ;;  %v507_v15 = vmul.f32 %v500_v63, %v492_v1  ;;  %v508_v16 = vmul.f32 %v504_v3, %v493_v0 }
  0xe4   : > { %1415 = vmatpush1.bf16.msra.mxu0 %v1414_v62 }
  0xe5   : > { %v514_v10 = vpop.permute.xlu1 %513  ;;  %v512_v11 = vpop.permute.xlu0 %511 }
  0xe6   : > { %v516_v12 = vsel %vm515_vm6, %v512_v11, %v514_v10  ;;  %v517_v13 = vsel %vm515_vm6, %v514_v10, %v512_v11 }
  0xe7   : > { %v531_v17 = vmul.f32 %v524_v4, %v516_v12  ;;  %v532_v18 = vmul.f32 %v528_v8, %v517_v13  ;;  %v756_v4 = vrot.slane %v1384_v58, %v1913_v6  ;;  %v760_v8 = vrot.slane %v1384_v58, %v1915_v7 }
  0xe9   : > { %v538_v20 = vpop.permute.xlu1 %537  ;;  %v1416_v21 = vpack.c.bf16 %v532_v18, %v508_v16  ;;  %v536_v22 = vpop.permute.xlu0 %535  ;;  %v1418_v23 = vpack.c.bf16 %v531_v17, %v507_v15 }
  0xea   : > { %v540_v24 = vsel %vm539_vm7, %v536_v22, %v538_v20  ;;  %v541_v25 = vsel %vm539_vm7, %v538_v20, %v536_v22  ;;  %v1385_v20 = vld [vmem:[%s2293_s0 + $0x6] ss:$8 sm:$0x3] }
  0xeb   : > { %1417 = vmatprep.subr.bf16.mxu0 %v1416_v21  ;;  %v556_v26 = vmul.f32 %v552_v14, %v541_v25  ;;  %v555_v27 = vmul.f32 %v548_v19, %v540_v24  ;;  %v1386_v21 = vld [vmem:[%s2293_s0 + $0x7] ss:$8 sm:$0x3]  ;;  %v778_v25 = vrot.slane %v1385_v20, %v1913_v6 }
  0xec   : > { %1419 = vmatpush1.bf16.msra.mxu0 %v1418_v23 }
  0xed   : > { %598 = vmatprep.subr.mxu0 %v556_v26  ;;  %v782_v26 = vrot.slane %v1385_v20, %v1915_v7  ;;  %v965_v20 = vld [vmem:[%s2293_s0] ss:$8 sm:$0x3] }
  0xf0   : > { %599 = vmatpush1.msra.mxu0 %v555_v27  ;;  %v800_v27 = vrot.slane %v1386_v21, %v1913_v6 }
  0xf1   : > { %1380 = vmatmul.mubr.msk.f32.vlgmr.msra.gmra.mrb[0].mxu0 %vm578_vm8, %v577_v28  ;;  %v804_v28 = vrot.slane %v1386_v21, %v1915_v7  ;;  %v1389_v21 = vld [vmem:[%s2293_s0 + $0x1] ss:$8 sm:$0x3] }
  0xf2   : > { %1223 = vmatprep.mubr.f32.mxu0 %v1663_v2 }
 0x1c4   : > { %v2004_v29 = vpop.f32.mrb[0].mxu0 }
 0x1c5   : > { %655 = vrot.lane.b32.xlu0 %v2004_v29, %s1658_s19  ;;  %v2008_v30 = vpop.f32.mrb[1].mxu0 }
 0x1c6   : > { %657 = vrot.lane.b32.xlu1 %v2008_v30, %s1658_s19 }
 0x1c9   : > { %677 = vrot.lane.b32.xlu0 %v2004_v29, %s1657_s17 }
 0x1ca   : > { %679 = vrot.lane.b32.xlu1 %v2008_v30, %s1657_s17 }
 0x1cd   : > { %699 = vrot.lane.b32.xlu0 %v2004_v29, %s2307_s15 }
 0x1ce   : > { %701 = vrot.lane.b32.xlu1 %v2008_v30, %s2307_s15 }
 0x1d1   : > { %721 = vrot.lane.b32.xlu0 %v2004_v29, %s1660_s24 }
 0x1d2   : > { %723 = vrot.lane.b32.xlu1 %v2008_v30, %s1660_s24 }
 0x1d5   : > { %745 = vrot.lane.b32.xlu0 %v2004_v29, %s1661_s25 }
 0x1d6   : > { %747 = vrot.lane.b32.xlu1 %v2008_v30, %s1661_s25 }
 0x1d9   : > { %767 = vrot.lane.b32.xlu0 %v2004_v29, %s1662_s26 }
 0x1da   : > { %769 = vrot.lane.b32.xlu1 %v2008_v30, %s1662_s26 }
 0x1dd   : > { %789 = vrot.lane.b32.xlu0 %v2004_v29, %s1664_s14 }
 0x1de   : > { %791 = vrot.lane.b32.xlu1 %v2008_v30, %s1664_s14 }
 0x1e1   : > { %811 = vrot.lane.b32.xlu0 %v2004_v29, %s2309_s29 }
 0x1e2   : > { %813 = vrot.lane.b32.xlu1 %v2008_v30, %s2309_s29 }
 0x237   : > { %v656_v2 = vpop.permute.xlu0 %655 }
 0x238   : > { %v658_v33 = vpop.permute.xlu1 %657 }
 0x239   : > { %v659_v38 = vsel %vm370_vm1, %v656_v2, %v658_v33  ;;  %v660_v39 = vsel %vm370_vm1, %v658_v33, %v656_v2  ;;  %v1387_v2 = vld [vmem:[%s2293_s0 + $0x10] ss:$8 sm:$0x3] }
 0x23a   : > { %v673_v44 = vmul.f32 %v666_v34, %v660_v39  ;;  %v674_v46 = vmul.f32 %v670_v36, %v659_v38 }
 0x23b   : > { %v678_v40 = vpop.permute.xlu0 %677 }
 0x23c   : > { %v680_v41 = vpop.permute.xlu1 %679 }
 0x23d   : > { %v681_v42 = vsel %vm393_vm0, %v678_v40, %v680_v41  ;;  %v682_v43 = vsel %vm393_vm0, %v680_v41, %v678_v40 }
 0x23e   : > { %v695_v45 = vmul.f32 %v688_v35, %v682_v43  ;;  %v696_v47 = vmul.f32 %v692_v37, %v681_v42  ;;  %v826_v37 = vrot.slane %v1387_v2, %v1915_v7 }
 0x23f   : > { %v700_v48 = vpop.permute.xlu0 %699 }
 0x240   : > { %v702_v51 = vpop.permute.xlu1 %701  ;;  %v1420_v52 = vpack.c.bf16 %v696_v47, %v674_v46  ;;  %v1422_v53 = vpack.c.bf16 %v695_v45, %v673_v44  ;;  %v822_v46 = vrot.slane %v1387_v2, %v1913_v6 }
 0x241   : > { %v703_v59 = vsel %vm417_vm2, %v700_v48, %v702_v51  ;;  %v704_v60 = vsel %vm417_vm2, %v702_v51, %v700_v48  ;;  %v851_v51 = vld [vmem:[#allocation6] sm:$0xff] }
 0x242   : > { %1421 = vmatprep.subr.bf16.mxu1 %v1420_v52  ;;  %v717_v9 = vmul.f32 %v710_v54, %v704_v60  ;;  %v718_v1 = vmul.f32 %v714_v55, %v703_v59 }
 0x243   : > { %v722_v61 = vpop.permute.xlu0 %721  ;;  %1423 = vmatpush1.bf16.msra.mxu1 %v1422_v53 }
 0x244   : > { %v724_v62 = vpop.permute.xlu1 %723 }
 0x245   : > { %v725_v63 = vsel %vm441_vm3, %v722_v61, %v724_v62  ;;  %v726_v3 = vsel %vm441_vm3, %v724_v62, %v722_v61  ;;  %v1666_v62 = vmov 0  }
 0x246   : > { %v739_v0 = vmul.f32 %v732_v56, %v726_v3  ;;  %v740_v10 = vmul.f32 %v736_v57, %v725_v63  ;;  %1519 = vset.pattern.permute.xlu0 %v1666_v62  ;;  %1520 = vset.pattern.permute.xlu1 %v1666_v62  ;;  %v927_v63 = vld [vmem:[%s2298_s5] sm:$0xff] }
 0x247   : > { %v746_v11 = vpop.permute.xlu0 %745 }
 0x248   : > { %v748_v12 = vpop.permute.xlu1 %747  ;;  %v1424_v13 = vpack.c.bf16 %v740_v10, %v718_v1  ;;  %v1426_v14 = vpack.c.bf16 %v739_v0, %v717_v9  ;;  %v926_v9 = vld [vmem:[%s2297_s4] sm:$0xff] }
 0x249   : > { %v749_v15 = vsel %vm467_vm4, %v746_v11, %v748_v12  ;;  %v750_v16 = vsel %vm467_vm4, %v748_v12, %v746_v11 }
 0x24a   : > { %v763_v17 = vmul.f32 %v756_v4, %v749_v15  ;;  %v764_v18 = vmul.f32 %v760_v8, %v750_v16  ;;  %1425 = vmatprep.subr.bf16.mxu1 %v1424_v13 }
 0x24b   : > { %v768_v19 = vpop.permute.xlu0 %767  ;;  %1427 = vmatpush1.bf16.msra.mxu1 %v1426_v14 }
 0x24c   : > { %v770_v22 = vpop.permute.xlu1 %769  ;;  %v1428_v23 = vpack.c.bf16 %v764_v18, %v2008_v30  ;;  %v1430_v24 = vpack.c.bf16 %v763_v17, %v2004_v29 }
 0x24d   : > { %v771_v31 = vsel %vm491_vm5, %v768_v19, %v770_v22  ;;  %v772_v32 = vsel %vm491_vm5, %v770_v22, %v768_v19 }
 0x24e   : > { %1429 = vmatprep.subr.bf16.mxu1 %v1428_v23  ;;  %v785_v38 = vmul.f32 %v778_v25, %v771_v31  ;;  %v786_v39 = vmul.f32 %v782_v26, %v772_v32  ;;  %v970_v23 = vrot.slane %v965_v20, %v1913_v6  ;;  %v992_v25 = vrot.slane %v1389_v21, %v1913_v6 }
 0x24f   : > { %v790_v33 = vpop.permute.xlu0 %789  ;;  %1431 = vmatpush1.bf16.msra.mxu1 %v1430_v24  ;;  %v974_v24 = vrot.slane %v965_v20, %v1915_v7  ;;  %v996_v26 = vrot.slane %v1389_v21, %v1915_v7  ;;  %v1395_v21 = vld [vmem:[%s2293_s0 + $0x10] ss:$8 sm:$0x3] }
 0x250   : > { %v792_v34 = vpop.permute.xlu1 %791 }
 0x251   : > { %v793_v35 = vsel %vm515_vm6, %v790_v33, %v792_v34  ;;  %v794_v36 = vsel %vm515_vm6, %v792_v34, %v790_v33 }
 0x252   : > { %v807_v40 = vmul.f32 %v800_v27, %v793_v35  ;;  %v808_v41 = vmul.f32 %v804_v28, %v794_v36 }
 0x253   : > { %v812_v42 = vpop.permute.xlu0 %811 }
 0x254   : > { %v814_v43 = vpop.permute.xlu1 %813  ;;  %v1432_v44 = vpack.c.bf16 %v808_v41, %v786_v39  ;;  %v1434_v45 = vpack.c.bf16 %v807_v40, %v785_v38  ;;  %v1390_v41 = vld [vmem:[%s2293_s0 + $0x2] ss:$8 sm:$0x3] }
 0x255   : > { %v816_v47 = vsel %vm539_vm7, %v814_v43, %v812_v42  ;;  %v815_v48 = vsel %vm539_vm7, %v812_v42, %v814_v43  ;;  %v1391_v42 = vld [vmem:[%s2293_s0 + $0x3] ss:$8 sm:$0x3] }
 0x256   : > { %v830_v49 = vmul.f32 %v826_v37, %v816_v47  ;;  %1433 = vmatprep.subr.bf16.mxu1 %v1432_v44  ;;  %v829_v50 = vmul.f32 %v822_v46, %v815_v48  ;;  %v1018_v46 = vrot.slane %v1390_v41, %v1915_v7  ;;  %v1036_v47 = vrot.slane %v1391_v42, %v1913_v6 }
 0x257   : > { %1435 = vmatpush1.bf16.msra.mxu1 %v1434_v45  ;;  %v1014_v45 = vrot.slane %v1390_v41, %v1913_v6  ;;  %v1040_v48 = vrot.slane %v1391_v42, %v1915_v7 }
 0x258   : > { %871 = vmatprep.subr.mxu1 %v830_v49  ;;  %v1392_v49 = vld [vmem:[%s2293_s0 + $0x5] ss:$8 sm:$0x3] }
 0x25b   : > { %872 = vmatpush1.msra.mxu1 %v829_v50 }
 0x25c   : > { %1388 = vmatmul.mubr.msk.f32.vlgmr.msra.gmra.mrb[0].mxu1 %vm578_vm8, %v851_v51 }
 0x32f   : > { %v921_v52 = vpop.f32.mrb[0].mxu1 }
 0x330   : > { %v923_v53 = vpop.f32.mrb[1].mxu1 }
 0x331   : > { %v928_v54 = vadd.f32 %v923_v53, %v921_v52 }
 0x333   : > { %929 = vadd.xlane.f32.xlu0 %v928_v54 }
 0x3c0   : > { %v930_v55 = vpop.xlane.xlu0 %929 }
 0x3c1   : > { %v931_v56 = vmul.f32 0.00390625, %v930_v55  ;;  %v1060_v55 = vrot.slane %v1392_v49, %v1913_v6 }
 0x3c3   : > { %v932_v57 = vsub.f32 %v921_v52, %v931_v56  ;;  %v933_v58 = vsub.f32 %v923_v53, %v931_v56  ;;  %v1064_v56 = vrot.slane %v1392_v49, %v1915_v7 }
 0x3c5   : > { %v934_v59 = vmul.f32 %v932_v57, %v932_v57  ;;  %v935_v60 = vmul.f32 %v933_v58, %v933_v58 }
 0x3c7   : > { %v936_v61 = vadd.f32 %v935_v60, %v934_v59 }
 0x3c9   : > { %937 = vadd.xlane.f32.xlu1 %v936_v61 }
 0x3da   : > { %952 = vperm.xlu1 %1520, %v927_v63  }
 0x456   : > { %v938_v3 = vpop.xlane.xlu1 %937 }
 0x457   : > { %v939_v4 = vmul.f32 0.00390625, %v938_v3 }
 0x459   : > { %v940_v8 = vadd.f32 1e-05, %v939_v4 }
 0x45a   : > { %v953_v11 = vpop.permute.xlu1 %952 }
 0x45b   : > { %1521 = vrsqrt.f32 %v940_v8 }
 0x465   : > { %v1522_v1 = vpop.eup %1521 }
 0x466   : > { %v942_v0 = vmul.f32 %v1522_v1, %v926_v9 }
 0x468   : > { %945 = vperm.xlu0 %1519, %v942_v0   ;;  %v1393_v0 = vld [vmem:[%s2293_s0 + $0x6] ss:$8 sm:$0x3] }
 0x4e7   : > { %v946_v10 = vpop.permute.xlu0 %945 }
 0x4e8   : > { %v948_v12 = vmul.f32 %v946_v10, %v932_v57  ;;  %v949_v13 = vmul.f32 %v946_v10, %v933_v58  ;;  %v1394_v10 = vld [vmem:[%s2293_s0 + $0x7] ss:$8 sm:$0x3] }
 0x4e9   : > { %v1108_v20 = vrot.slane %v1394_v10, %v1915_v7 }
 0x4ea   : > { %v955_v14 = vadd.f32 %v953_v11, %v948_v12  ;;  %v956_v15 = vadd.f32 %v953_v11, %v949_v13 }
 0x4ec   : > { %v2121_v16 = vmax.f32 %v955_v14, 0.0  ;;  %v2127_v17 = vmax.f32 %v956_v15, 0.0  ;;  %v1082_v15 = vrot.slane %v1393_v0, %v1913_v6 }
 0x4ee   : > { %1025 = vrot.lane.b32.xlu0 %v2121_v16, %s1660_s24  ;;  %959 = vrot.lane.b32.xlu1 %v2121_v16, %s1658_s19 }
 0x4f2   : > { %1049 = vrot.lane.b32.xlu0 %v2121_v16, %s1661_s25  ;;  %961 = vrot.lane.b32.xlu1 %v2127_v17, %s1658_s19 }
 0x4f6   : > { %1071 = vrot.lane.b32.xlu0 %v2121_v16, %s1662_s26  ;;  %981 = vrot.lane.b32.xlu1 %v2121_v16, %s1657_s17 }
 0x4fa   : > { %1093 = vrot.lane.b32.xlu0 %v2121_v16, %s1664_s14  ;;  %983 = vrot.lane.b32.xlu1 %v2127_v17, %s1657_s17 }
 0x4fe   : > { %1115 = vrot.lane.b32.xlu0 %v2121_v16, %s2328_s18  ;;  %1003 = vrot.lane.b32.xlu1 %v2121_v16, %s2329_s22 }
 0x502   : > { %1005 = vrot.lane.b32.xlu1 %v2127_v17, %s2329_s22  ;;  %s2330_s22 = sshll.u32 %s1859_s3, 4 }
 0x503   : > { %s361_s17 = scalar_lea.vmem [#allocation8], %s2330_s22 }
 0x504   : > { %s1282_s19 = sshll.u32 %s361_s17, 4  ;;  %s2251_s19 = int_to_ptr.vmem [resolvable:$true] %s1282_s19 }
 0x506   : > { %1027 = vrot.lane.b32.xlu1 %v2127_v17, %s1660_s24 }
 0x50a   : > { %1051 = vrot.lane.b32.xlu1 %v2127_v17, %s1661_s25 }
 0x50e   : > { %1073 = vrot.lane.b32.xlu1 %v2127_v17, %s1662_s26  ;;  %s1583_s26 = scalar_lea.vmem %s2251_s19, 256 }
 0x50f   : > { %p1584_p6 = scmp.ne.s32.totalorder %s2251_s19, %s1583_s26 }
 0x511   : > { %p1585_p9 = pnand %p1584_p6, %p1810_p8 }
 0x512   : > { %1095 = vrot.lane.b32.xlu1 %v2127_v17, %s1664_s14  ;;  %s1667_s14 = smov [#allocation8]  }
 0x513   : > { %p1586_p12 = pneg %p1585_p9  ;;  %s1587_s29 = sshll.u32 %s1667_s14, 4  ;;  %s1588_s29 = int_to_ptr.vmem [resolvable:$false] %s1587_s29 }
 0x514   : > { %s1589_s23 = scalar_lea.vmem %s1588_s29, 512  ;;  %p1590_p13 = scmp.lt.s32.totalorder %s2251_s19, %s1588_s29 }
 0x515   : > { %p1591_p0 = scmp.lt.s32.totalorder %s1589_s23, %s1583_s26 }
 0x516   : > { %1117 = vrot.lane.b32.xlu1 %v2127_v17, %s2328_s18  ;;  %s1403_s18 = sshll.u32 %s1739_s13, 8  ;;  %s1268_s13 = scalar_lea.sflag [#allocation5], %s1859_s3 }
 0x517   : > { %s2249_s25 = scalar_lea.hbm %s2302_s9, %s1403_s18  ;;  %p1592_p5 = por %p1591_p0, %p1590_p13 }
 0x519   : > { %p1593_p10 = pnand %p1592_p5, %p1586_p12 }
 0x560   : > { %v960_v18 = vpop.permute.xlu1 %959  ;;  %v1026_v37 = vpop.permute.xlu0 %1025 }
 0x564   : > { %v962_v19 = vpop.permute.xlu1 %961  ;;  %v1050_v44 = vpop.permute.xlu0 %1049 }
 0x565   : > { %v963_v27 = vsel %vm370_vm1, %v960_v18, %v962_v19  ;;  %v964_v28 = vsel %vm370_vm1, %v962_v19, %v960_v18  ;;  %v1086_v18 = vrot.slane %v1393_v0, %v1915_v7  ;;  %v1104_v19 = vrot.slane %v1394_v10, %v1913_v6 }
 0x566   : > { %v977_v33 = vmul.f32 %v970_v23, %v964_v28  ;;  %v978_v34 = vmul.f32 %v974_v24, %v963_v27 }
 0x568   : > { %v982_v22 = vpop.permute.xlu1 %981  ;;  %v1072_v61 = vpop.permute.xlu0 %1071 }
 0x56c   : > { %v984_v2 = vpop.permute.xlu1 %983  ;;  %v1094_v14 = vpop.permute.xlu0 %1093 }
 0x56d   : > { %v985_v31 = vsel %vm393_vm0, %v982_v22, %v984_v2  ;;  %v986_v32 = vsel %vm393_vm0, %v984_v2, %v982_v22 }
 0x56e   : > { %v999_v35 = vmul.f32 %v992_v25, %v986_v32  ;;  %v1000_v36 = vmul.f32 %v996_v26, %v985_v31  ;;  %v1130_v25 = vrot.slane %v1395_v21, %v1915_v7 }
 0x570   : > { %v1438_v38 = vpack.c.bf16 %v999_v35, %v977_v33  ;;  %v1004_v39 = vpop.permute.xlu1 %1003  ;;  %v1436_v40 = vpack.c.bf16 %v1000_v36, %v978_v34  ;;  %v1116_v31 = vpop.permute.xlu0 %1115  ;;  %v1126_v35 = vrot.slane %v1395_v21, %v1913_v6 }
 0x572   : > { %1437 = vmatprep.subr.bf16.mxu0 %v1436_v40 }
 0x573   : > { %1439 = vmatpush1.bf16.msra.mxu0 %v1438_v38 }
 0x574   : > { %v1006_v43 = vpop.permute.xlu1 %1005 }
 0x575   : > { %v1007_v50 = vsel %vm417_vm2, %v1004_v39, %v1006_v43  ;;  %v1008_v51 = vsel %vm417_vm2, %v1006_v43, %v1004_v39  ;;  %v1155_v39 = vld [vmem:[%s2299_s6] sm:$0xff] }
 0x576   : > { %v1021_v57 = vmul.f32 %v1014_v45, %v1008_v51  ;;  %v1022_v58 = vmul.f32 %v1018_v46, %v1007_v50 }
 0x578   : > { %v1028_v52 = vpop.permute.xlu1 %1027 }
 0x579   : > { %v1029_v53 = vsel %vm441_vm3, %v1026_v37, %v1028_v52  ;;  %v1030_v54 = vsel %vm441_vm3, %v1028_v52, %v1026_v37  ;;  %v1230_v52 = vld [vmem:[%s2300_s7] sm:$0xff] }
 0x57a   : > { %v1043_v59 = vmul.f32 %v1036_v47, %v1030_v54  ;;  %v1044_v60 = vmul.f32 %v1040_v48, %v1029_v53  ;;  %v1231_v48 = vld [vmem:[%s2301_s8] sm:$0xff] }
 0x57c   : > { %v1442_v62 = vpack.c.bf16 %v1043_v59, %v1021_v57  ;;  %v1052_v63 = vpop.permute.xlu1 %1051  ;;  %v1440_v3 = vpack.c.bf16 %v1044_v60, %v1022_v58 }
 0x57d   : > { %v1053_v4 = vsel %vm467_vm4, %v1050_v44, %v1052_v63  ;;  %v1054_v8 = vsel %vm467_vm4, %v1052_v63, %v1050_v44 }
 0x57e   : > { %v1067_v9 = vmul.f32 %v1060_v55, %v1053_v4  ;;  %v1068_v1 = vmul.f32 %v1064_v56, %v1054_v8  ;;  %1441 = vmatprep.subr.bf16.mxu0 %v1440_v3 }
 0x57f   : > { %1443 = vmatpush1.bf16.msra.mxu0 %v1442_v62 }
 0x580   : > { %v1446_v11 = vpack.c.bf16 %v1067_v9, %v2121_v16  ;;  %v1074_v12 = vpop.permute.xlu1 %1073  ;;  %v1444_v13 = vpack.c.bf16 %v1068_v1, %v2127_v17 }
 0x581   : > { %v1075_v16 = vsel %vm491_vm5, %v1072_v61, %v1074_v12  ;;  %v1076_v17 = vsel %vm491_vm5, %v1074_v12, %v1072_v61 }
 0x582   : > { %1445 = vmatprep.subr.bf16.mxu0 %v1444_v13  ;;  %v1089_v26 = vmul.f32 %v1082_v15, %v1075_v16  ;;  %v1090_v27 = vmul.f32 %v1086_v18, %v1076_v17 }
 0x583   : > { %1447 = vmatpush1.bf16.msra.mxu0 %v1446_v11 }
 0x584   : > { %v1096_v22 = vpop.permute.xlu1 %1095 }
 0x585   : > { %v1097_v23 = vsel %vm515_vm6, %v1094_v14, %v1096_v22  ;;  %v1098_v24 = vsel %vm515_vm6, %v1096_v22, %v1094_v14 }
 0x586   : > { %v1111_v28 = vmul.f32 %v1104_v19, %v1097_v23  ;;  %v1112_v2 = vmul.f32 %v1108_v20, %v1098_v24 }
 0x588   : > { %v1450_v32 = vpack.c.bf16 %v1111_v28, %v1089_v26  ;;  %v1118_v33 = vpop.permute.xlu1 %1117  ;;  %v1448_v34 = vpack.c.bf16 %v1112_v2, %v1090_v27 }
 0x589   : > { %v1120_v36 = vsel %vm539_vm7, %v1118_v33, %v1116_v31  ;;  %v1119_v37 = vsel %vm539_vm7, %v1116_v31, %v1118_v33 }
 0x58a   : > { %v1134_v38 = vmul.f32 %v1130_v25, %v1120_v36  ;;  %1449 = vmatprep.subr.bf16.mxu0 %v1448_v34  ;;  %v1133_v7 = vmul.f32 %v1126_v35, %v1119_v37 }
 0x58b   : > { %1451 = vmatpush1.bf16.msra.mxu0 %v1450_v32 }
 0x58c   : > { %1175 = vmatprep.subr.mxu0 %v1134_v38 }
 0x58f   : > { %1176 = vmatpush1.msra.mxu0 %v1133_v7 }
 0x590   : > { %1396 = vmatmul.mubr.msk.f32.vlgmr.msra.gmra.mrb[2].mxu0 %vm578_vm8, %v1155_v39 }
 0x663   : > { %v1225_v40 = vpop.f32.mrb[2].mxu0 }
 0x664   : > { %v1227_v6 = vpop.f32.mrb[3].mxu0 }
 0x665   : > { %v1232_v41 = vadd.f32 %v1227_v6, %v1225_v40 }
 0x667   : > { %1233 = vadd.xlane.f32.xlu0 %v1232_v41 }
 0x6f4   : > { %v1234_v42 = vpop.xlane.xlu0 %1233 }
 0x6f5   : > { %v1235_v43 = vmul.f32 0.00390625, %v1234_v42 }
 0x6f7   : > { %v1236_v5 = vsub.f32 %v1225_v40, %v1235_v43  ;;  %v1237_v44 = vsub.f32 %v1227_v6, %v1235_v43 }
 0x6f9   : > { %v1238_v45 = vmul.f32 %v1236_v5, %v1236_v5  ;;  %v1239_v46 = vmul.f32 %v1237_v44, %v1237_v44 }
 0x6fb   : > { %v1240_v47 = vadd.f32 %v1239_v46, %v1238_v45 }
 0x6fd   : > { %1241 = vadd.xlane.f32.xlu1 %v1240_v47 }
 0x70e   : > { %1256 = vperm.xlu1 %1520, %v1231_v48  }
 0x78a   : > { %v1242_v49 = vpop.xlane.xlu1 %1241 }
 0x78b   : > { %v1243_v50 = vmul.f32 0.00390625, %v1242_v49 }
 0x78d   : > { %v1244_v51 = vadd.f32 1e-05, %v1243_v50 }
 0x78e   : > { %v1257_v58 = vpop.permute.xlu1 %1256 }
 0x78f   : > { %1523 = vrsqrt.f32 %v1244_v51 }
 0x799   : > { %v1524_v53 = vpop.eup %1523 }
 0x79a   : > { %v1246_v54 = vmul.f32 %v1524_v53, %v1230_v52 }
 0x79c   : > { %1249 = vperm.xlu0 %1519, %v1246_v54  }
 0x81b   : > { %v1250_v55 = vpop.permute.xlu0 %1249 }
 0x81c   : > { %v1252_v56 = vmul.f32 %v1250_v55, %v1236_v5  ;;  %v1253_v57 = vmul.f32 %v1250_v55, %v1237_v44 }
 0x81e   : > { %v1259_v59 = vadd.f32 %v1257_v58, %v1252_v56  ;;  %v1260_v60 = vadd.f32 %v1257_v58, %v1253_v57 }
 0x820   : > { %v1263_v61 = vadd.f32 %v1259_v59, %v2004_v29  ;;  %v1264_v62 = vadd.f32 %v1260_v60, %v2008_v30 }
 0x822   : > { %1265 = vst [vmem:[%s361_s17] sm:$0xff] %v1263_v61  ;;  %1266 = vst [vmem:[%s361_s17 + $0x8] sm:$0xff] %v1264_v62 }
 0x823   : > { %1596 = shalt.err (!%p1593_p10)
}
 0x824   : > { %s1597_s3 = scalar_lea.hbm %s2249_s25, 256  ;;  %s1601_s22 = scalar_lea.hbm %s2302_s9, 512 }
 0x825   : > { %p1598_p1 = scmp.ne.s32.totalorder %s2249_s25, %s1597_s3  ;;  %p1602_p3 = scmp.lt.u32.totalorder %s2249_s25, %s2302_s9 }
 0x826   : > { %p1603_p11 = scmp.lt.u32.totalorder %s1601_s22, %s1597_s3  ;;  %p1605_p6 = scmp.lt.u32.totalorder %s1597_s3, %s2249_s25 }
 0x827   : > { %p1599_p2 = pnand %p1598_p1, %p1810_p8 }
 0x828   : > { %p1604_p4 = por %p1603_p11, %p1602_p3 }
 0x829   : > { %p1600_p7 = pneg %p1599_p2 }
 0x82a   : > { %p1606_p9 = por %p1605_p6, %p1604_p4 }
 0x82c   : > { %p1607_p12 = pnand %p1606_p9, %p1600_p7 }
 0x82e   : > { %1610 = shalt.err (!%p1607_p12)
}
 0x82f   : > { %1458 = dma.vmem_to_hbm [thread:$0]  (%p1810_p8), %s2251_s19, 256, %s2249_s25, %s1268_s13  }
 0x830 PF: > { %s1294_s24 = sand.u32 1, %s1641_s30   ;;  %p2331_p13 = scmp.ne.s32.totalorder %s2313_s16, 0 }
 0x831   : > { %p2332_p0 = scmp.ge.s32.totalorder %s1653_s12, 2  ;;  %s1295_s26 = scalar_lea.sflag [#allocation5], %s1294_s24 }
 0x833   : > { %p1469_p5 = pnand %p2332_p0, %p2331_p13 }
 0x835   : > { %1636 = dma.done.wait (!%p1469_p5), %s1295_s26, 256  }
 0x836   : > { %1638 = vsyncadd (!%p1469_p5), %s1295_s26, 4294967040  ;;  %p23_p10 = scmp.ge.s32.totalorder %s1766_s20, 4   ;;  %s2333_s30 = smov %s1645_s10 }
 0x837   : > { %s2334_s10 = smov %s1649_s11  ;;  %s2335_s11 = smov %s1802_s27 }
 0x838   : > { %s2336_s12 = smov %s1766_s20  ;;  %25 = sbr.rel (!%p23_p10) target bundleno = 8 (0x8), region = 112 }
 0x83f   :  { %1300 = vsyncpa [#allocation4], 1 }
 0x840   :  { %1302 = vsyncpa [#allocation4 + $0x1], 1 }
 0x841   :  { %1303 = vsyncpa [#allocation7], 1 }
 0x842   :  { %1304 = vsyncpa [#allocation5], 1 }
 0x843   :  { %1306 = vsyncpa [#allocation5 + $0x1], 1 }

</bundles_post_ra>
